<compile_context>
chip_gen: v6e
topology: v6e:2x2x1
jax: 0.10.0
libtpu: 0.0.40
codegen_flags: <defaults>
</compile_context>

<pallas_src>
import math

import jax
import jax.numpy as jnp
from jax.experimental import pallas as pl
from jax.experimental.pallas import tpu as pltpu


def _round_up(x, m):
    return (x + m - 1) // m * m


def _padded_vmem_bytes(shape, itemsize):
    """VMEM footprint of a 2-D block after (8, 128) tile padding."""
    assert len(shape) == 2
    return _round_up(shape[0], 8) * _round_up(shape[1], 128) * itemsize


# ----------------------------------------------------------------------------
# Kernel
# ----------------------------------------------------------------------------
def _make_coupling_kernel(n_lin, matmul_dtype):
    """s-stream (Tanh) and t-stream (ReLU) MLPs + coupling epilogue, batch-major."""

    def mm(h, w_ref):
        # h: (TB, Fin) activations; w_ref: (Fout, Fin) PyTorch-layout weight (pre-cast
        # to matmul_dtype in the wrapper).  Contract both minor dims ('bk,nk->bn'):
        # the attention-style MXU orientation, f32 accumulation.
        return jax.lax.dot_general(
            h.astype(matmul_dtype), w_ref[...],
            (((1,), (1,)), ((), ())),
            preferred_element_type=jnp.float32)

    def kernel(*refs):
        x_ref, invm_ref = refs[0], refs[1]
        w_s = refs[2:2 + n_lin]
        b_s = refs[2 + n_lin:2 + 2 * n_lin]
        w_t = refs[2 + 2 * n_lin:2 + 3 * n_lin]
        b_t = refs[2 + 3 * n_lin:2 + 4 * n_lin]
        u_ref, logs_ref = refs[2 + 4 * n_lin], refs[3 + 4 * n_lin]

        x = x_ref[...]                      # (TB, D) f32 batch tile
        inv_mask = invm_ref[...]            # (1, D) = 1 - mask
        # x * mask is NOT computed here: the mask is folded into the layer-0 weights.
        # TODO(synk): conditional path (y is not None) would concatenate y onto the
        # layer-0 input; this kernel implements the y=None forward exactly.

        # s-stream: Linear -> (Tanh -> Linear) * (n_lin - 1)
        h = mm(x, w_s[0]) + b_s[0][...]
        for i in range(1, n_lin):
            h = mm(jnp.tanh(h), w_s[i]) + b_s[i][...]
        s = h                               # (TB, D)

        # t-stream: Linear -> (ReLU -> Linear) * (n_lin - 1)
        h = mm(x, w_t[0]) + b_t[0][...]
        for i in range(1, n_lin):
            h = mm(jnp.maximum(h, 0.0), w_t[i]) + b_t[i][...]
        t = h * inv_mask                    # (TB, D)

        log_s = jnp.tanh(s) * inv_mask      # one tanh + one exp per output element
        u_ref[...] = (x * jnp.exp(log_s) + t).astype(u_ref.dtype)
        logs_ref[...] = log_s.astype(logs_ref.dtype)

    return kernel


# ----------------------------------------------------------------------------
# Tile sizing / wrapper
# ----------------------------------------------------------------------------
def _vmem_config():
    """Generation-aware scoped-VMEM limit.  v5e/v6e: 128 MiB physical (defaults 16/32);
    v7x: 64 MiB physical and 2 TensorCores (prefer an even grid-step count)."""
    try:
        kind = jax.devices()[0].device_kind.lower()
    except Exception:
        kind = ""
    if "v7" in kind:
        return 40 * 1024 * 1024, True
    return 64 * 1024 * 1024, False


def _pick_block_b(B, D, layer_widths, param_bytes, budget, prefer_even_steps):
    """Largest batch tile under the VMEM budget (fewest grid steps: per-step overhead
    ~0.35 us dominates at small D/H).  Accounts for lane padding of the narrow (TB, D)
    I/O blocks, live hidden activations, and double-buffered constants."""
    lane_d = _round_up(D, 128)
    max_feat = max([lane_d] + [_round_up(w, 128) for w in layer_widths])
    io_per_row = 3 * 2 * lane_d * 4                  # x, u, log_s, double-buffered
    act_per_row = (4 * max_feat + 3 * lane_d) * 4    # live s/t activations + epilogue temps
    fixed = 2 * param_bytes                          # grid-invariant weights/biases (2 bufs)
    # TODO(synk): single-buffer the grid-invariant params (pipeline_mode=pl.Buffered(1))
    # once confirmed supported on top-level pallas_call BlockSpecs; then count them once.

    def fits(tb):
        return fixed + tb * (io_per_row + act_per_row) <= budget

    if fits(B):
        block = B
    else:
        block = None
        for c in (16384, 8192, 4096, 2048, 1024, 512, 256, 128):
            if B % c == 0 and fits(c):
                block = c
                break
        if block is None:
            block = B  # tiny/odd batch fallback: single full-array step
    # v7x: keep the step count even so both TensorCores get work.
    if prefer_even_steps and (B // block) % 2 == 1 and block >= 256 and block % 16 == 0:
        block //= 2
    return block


def linear_masked_coupling_forward(x, mask, s_params, t_params, *,
                                   block_b=None, matmul_dtype=jnp.float32,
                                   out_dtype=None):
    """x: (B, D) f32.  mask: (D,) or (1, D) binary.  s_params / t_params: flat lists
    [W0, b0, W1, b1, ...] in PyTorch layout (W_i: (out, in), b_i: (out,)).
    Returns (u, log_abs_det_jacobian), each (B, D).  y=None forward only.
    out_dtype=jnp.bfloat16 halves output HBM writeback if downstream tolerates it."""
    B, D = x.shape
    n_lin = len(s_params) // 2
    out_dtype = x.dtype if out_dtype is None else out_dtype

    mask_row = jnp.asarray(mask, jnp.float32).reshape(1, D)
    inv_mask = 1.0 - mask_row

    def prep(params):
        ws, bs = [], []
        for i in range(n_lin):
            w = jnp.asarray(params[2 * i], jnp.float32)
            b = jnp.asarray(params[2 * i + 1], jnp.float32).reshape(1, -1)
            if i == 0:
                w = w * mask_row            # fold x*mask into the layer-0 columns (exact)
            ws.append(w.astype(matmul_dtype))   # pre-cast once; no per-step VPU casts
            bs.append(b)                        # biases stay f32 (added after the MXU)
        return ws, bs

    ws_s, bs_s = prep(s_params)
    ws_t, bs_t = prep(t_params)
    consts = [inv_mask, *ws_s, *bs_s, *ws_t, *bs_t]
    param_bytes = sum(_padded_vmem_bytes(p.shape, p.dtype.itemsize) for p in consts)

    vmem_limit, prefer_even = _vmem_config()
    if block_b is None:
        widths = [w.shape[0] for w in ws_s]
        block_b = _pick_block_b(B, D, widths, param_bytes,
                                vmem_limit - 8 * 1024 * 1024, prefer_even)
    assert B % block_b == 0, "batch must be divisible by block_b"
    grid = (B // block_b,)

    kernel = _make_coupling_kernel(n_lin, matmul_dtype)

    x_spec = pl.BlockSpec((block_b, D), lambda i: (i, 0))
    out_spec0 = pl.BlockSpec((block_b, D), lambda i: (i, 0))
    out_spec1 = pl.BlockSpec((block_b, D), lambda i: (i, 0))

    def const_spec(a):
        # Full-array, grid-invariant block: DMA'd once, resident in VMEM across steps.
        return pl.BlockSpec(a.shape, lambda i: (0, 0))

    u, log_s = pl.pallas_call(
        kernel,
        grid_spec=pltpu.PrefetchScalarGridSpec(
            num_scalar_prefetch=0,
            grid=grid,
            in_specs=[x_spec] + [const_spec(c) for c in consts],
            out_specs=[out_spec0, out_spec1],
        ),
        out_shape=(jax.ShapeDtypeStruct((B, D), out_dtype),
                   jax.ShapeDtypeStruct((B, D), out_dtype)),
        compiler_params=pltpu.CompilerParams(
            dimension_semantics=("parallel",),      # independent batch tiles
            vmem_limit_bytes=vmem_limit),           # matches the tile-sizing budget
    )(x, *consts)
    return u, log_s


# ----------------------------------------------------------------------------
# Parameter construction + pure-JAX reference
# ----------------------------------------------------------------------------
def init_linear(key, fan_in, fan_out):
    """PyTorch-style Linear init: U(-1/sqrt(fan_in), 1/sqrt(fan_in)); layout (out, in)."""
    kw, kb = jax.random.split(key)
    bound = 1.0 / math.sqrt(fan_in)
    w = jax.random.uniform(kw, (fan_out, fan_in), jnp.float32, -bound, bound)
    b = jax.random.uniform(kb, (fan_out,), jnp.float32, -bound, bound)
    return w, b


def build_params(key, input_size, hidden_size, n_hidden, cond_label_size=None):
    """s_net Linear shapes: (D_in->H), n_hidden*(H->H), (H->D). t_net = deepcopy(s_net)."""
    d_in = input_size + (cond_label_size if cond_label_size is not None else 0)
    dims = [(d_in, hidden_size)] + [(hidden_size, hidden_size)] * n_hidden \
           + [(hidden_size, input_size)]
    s_params = []
    for (fi, fo) in dims:
        key, sub = jax.random.split(key)
        w, b = init_linear(sub, fi, fo)
        s_params += [w, b]
    # PyTorch does t_net = copy.deepcopy(s_net): identical initial weights.
    t_params = [jnp.array(p) for p in s_params]
    return s_params, t_params


def ref_forward(x, mask, s_params, t_params):
    """Pure-JAX reference of the PyTorch forward (y=None)."""
    n_lin = len(s_params) // 2
    mask = jnp.asarray(mask, jnp.float32).reshape(1, -1)
    mx = x * mask
    h = mx
    for i in range(n_lin):
        if i > 0:
            h = jnp.tanh(h)
        h = h @ s_params[2 * i].T + s_params[2 * i + 1]
    s = h
    h = mx
    for i in range(n_lin):
        if i > 0:
            h = jnp.maximum(h, 0.0)
        h = h @ t_params[2 * i].T + t_params[2 * i + 1]
    t = h * (1.0 - mask)
    log_s = jnp.tanh(s) * (1.0 - mask)
    u = x * jnp.exp(log_s) + t
    return u, log_s


if __name__ == "__main__":
    key = jax.random.PRNGKey(0)

    batch = 256
    input_size = 8
    hidden_size = 32
    n_hidden = 2

    k_x, k_p = jax.random.split(key)
    x = jax.random.normal(k_x, (batch, input_size), jnp.float32)
    # Alternating binary mask (MAF-style checkerboard over features).
    mask = (jnp.arange(input_size) % 2).astype(jnp.float32).reshape(1, input_size)

    s_params, t_params = build_params(k_p, input_size, hidden_size, n_hidden)
    u_ref, log_ref = ref_forward(x, mask, s_params, t_params)

    # f32 path, auto-picked tile (single grid step at this batch size).
    u, log_det = linear_masked_coupling_forward(x, mask, s_params, t_params)
    jax.block_until_ready((u, log_det))
    assert jnp.allclose(u, u_ref, atol=1e-5, rtol=1e-5)
    assert jnp.allclose(log_det, log_ref, atol=1e-5, rtol=1e-5)

    # Forced smaller tile: exercises the multi-step (pipelined) grid path.
    u2, log2 = linear_masked_coupling_forward(x, mask, s_params, t_params, block_b=128)
    jax.block_until_ready((u2, log2))
    assert jnp.allclose(u2, u_ref, atol=1e-5, rtol=1e-5)
    assert jnp.allclose(log2, log_ref, atol=1e-5, rtol=1e-5)

    # bf16 matmul inputs (f32 accumulation): MXU fast path, looser tolerance.
    u16, log16 = linear_masked_coupling_forward(
        x, mask, s_params, t_params, matmul_dtype=jnp.bfloat16)
    jax.block_until_ready((u16, log16))
    assert jnp.allclose(u16, u_ref, atol=1e-1, rtol=1e-1)
    assert jnp.allclose(log16, log_ref, atol=1e-1, rtol=1e-1)

    print("KERNEL_OK")
</pallas_src>

<mosaic_0001>
module attributes {stable_mosaic.version = 11 : i64} {
  func.func @kernel(%arg0: i32, %arg1: memref<256x8xf32, #tpu.memory_space<vmem>>, %arg2: memref<1x8xf32, #tpu.memory_space<vmem>>, %arg3: memref<32x8xf32, #tpu.memory_space<vmem>>, %arg4: memref<32x32xf32, #tpu.memory_space<vmem>>, %arg5: memref<32x32xf32, #tpu.memory_space<vmem>>, %arg6: memref<8x32xf32, #tpu.memory_space<vmem>>, %arg7: memref<1x32xf32, #tpu.memory_space<vmem>>, %arg8: memref<1x32xf32, #tpu.memory_space<vmem>>, %arg9: memref<1x32xf32, #tpu.memory_space<vmem>>, %arg10: memref<1x8xf32, #tpu.memory_space<vmem>>, %arg11: memref<32x8xf32, #tpu.memory_space<vmem>>, %arg12: memref<32x32xf32, #tpu.memory_space<vmem>>, %arg13: memref<32x32xf32, #tpu.memory_space<vmem>>, %arg14: memref<8x32xf32, #tpu.memory_space<vmem>>, %arg15: memref<1x32xf32, #tpu.memory_space<vmem>>, %arg16: memref<1x32xf32, #tpu.memory_space<vmem>>, %arg17: memref<1x32xf32, #tpu.memory_space<vmem>>, %arg18: memref<1x8xf32, #tpu.memory_space<vmem>>, %arg19: memref<256x8xf32, #tpu.memory_space<vmem>>, %arg20: memref<256x8xf32, #tpu.memory_space<vmem>>) attributes {dimension_semantics = [#tpu.dimension_semantics<parallel>], iteration_bounds = array<i64: 1>, scalar_prefetch = 0 : i64, scratch_operands = 0 : i64, tpu.core_type = #tpu.core_type<tc>, window_params = [{transform_indices = @transform_0, window_bounds = array<i64: 256, 8>}, {pipeline_mode = #tpu.pipeline_mode<synchronous>, transform_indices = @transform_1, window_bounds = array<i64: 1, 8>}, {pipeline_mode = #tpu.pipeline_mode<synchronous>, transform_indices = @transform_2, window_bounds = array<i64: 32, 8>}, {pipeline_mode = #tpu.pipeline_mode<synchronous>, transform_indices = @transform_3, window_bounds = array<i64: 32, 32>}, {pipeline_mode = #tpu.pipeline_mode<synchronous>, transform_indices = @transform_4, window_bounds = array<i64: 32, 32>}, {pipeline_mode = #tpu.pipeline_mode<synchronous>, transform_indices = @transform_5, window_bounds = array<i64: 8, 32>}, {pipeline_mode = #tpu.pipeline_mode<synchronous>, transform_indices = @transform_6, window_bounds = array<i64: 1, 32>}, {pipeline_mode = #tpu.pipeline_mode<synchronous>, transform_indices = @transform_7, window_bounds = array<i64: 1, 32>}, {pipeline_mode = #tpu.pipeline_mode<synchronous>, transform_indices = @transform_8, window_bounds = array<i64: 1, 32>}, {pipeline_mode = #tpu.pipeline_mode<synchronous>, transform_indices = @transform_9, window_bounds = array<i64: 1, 8>}, {pipeline_mode = #tpu.pipeline_mode<synchronous>, transform_indices = @transform_10, window_bounds = array<i64: 32, 8>}, {pipeline_mode = #tpu.pipeline_mode<synchronous>, transform_indices = @transform_11, window_bounds = array<i64: 32, 32>}, {pipeline_mode = #tpu.pipeline_mode<synchronous>, transform_indices = @transform_12, window_bounds = array<i64: 32, 32>}, {pipeline_mode = #tpu.pipeline_mode<synchronous>, transform_indices = @transform_13, window_bounds = array<i64: 8, 32>}, {pipeline_mode = #tpu.pipeline_mode<synchronous>, transform_indices = @transform_14, window_bounds = array<i64: 1, 32>}, {pipeline_mode = #tpu.pipeline_mode<synchronous>, transform_indices = @transform_15, window_bounds = array<i64: 1, 32>}, {pipeline_mode = #tpu.pipeline_mode<synchronous>, transform_indices = @transform_16, window_bounds = array<i64: 1, 32>}, {pipeline_mode = #tpu.pipeline_mode<synchronous>, transform_indices = @transform_17, window_bounds = array<i64: 1, 8>}, {transform_indices = @transform_18, window_bounds = array<i64: 256, 8>}, {transform_indices = @transform_19, window_bounds = array<i64: 256, 8>}]} {
    %c0 = arith.constant 0 : index
    %c0_0 = arith.constant 0 : index
    %0 = vector.load %arg1[%c0, %c0_0] : memref<256x8xf32, #tpu.memory_space<vmem>>, vector<256x8xf32>
    %c0_1 = arith.constant 0 : index
    %c0_2 = arith.constant 0 : index
    %1 = vector.load %arg2[%c0_1, %c0_2] : memref<1x8xf32, #tpu.memory_space<vmem>>, vector<1x8xf32>
    %c0_3 = arith.constant 0 : index
    %c0_4 = arith.constant 0 : index
    %2 = vector.load %arg3[%c0_3, %c0_4] : memref<32x8xf32, #tpu.memory_space<vmem>>, vector<32x8xf32>
    %cst = arith.constant dense<0.000000e+00> : vector<256x32xf32>
    %3 = tpu.matmul %0, %2, %cst {dimension_numbers = #tpu.dot_dimension_numbers<[1], [1], [0], [0], [0, 0, 1, 0], [], []>} : vector<256x8xf32>, vector<32x8xf32>, vector<256x32xf32> -> vector<256x32xf32>
    %c0_5 = arith.constant 0 : index
    %c0_6 = arith.constant 0 : index
    %4 = vector.load %arg7[%c0_5, %c0_6] : memref<1x32xf32, #tpu.memory_space<vmem>>, vector<1x32xf32>
    %5 = vector.broadcast %4 : vector<1x32xf32> to vector<256x32xf32>
    %6 = arith.addf %3, %5 : vector<256x32xf32>
    %7 = math.tanh %6 : vector<256x32xf32>
    %c0_7 = arith.constant 0 : index
    %c0_8 = arith.constant 0 : index
    %8 = vector.load %arg4[%c0_7, %c0_8] : memref<32x32xf32, #tpu.memory_space<vmem>>, vector<32x32xf32>
    %cst_9 = arith.constant dense<0.000000e+00> : vector<256x32xf32>
    %9 = tpu.matmul %7, %8, %cst_9 {dimension_numbers = #tpu.dot_dimension_numbers<[1], [1], [0], [0], [0, 0, 1, 0], [], []>} : vector<256x32xf32>, vector<32x32xf32>, vector<256x32xf32> -> vector<256x32xf32>
    %c0_10 = arith.constant 0 : index
    %c0_11 = arith.constant 0 : index
    %10 = vector.load %arg8[%c0_10, %c0_11] : memref<1x32xf32, #tpu.memory_space<vmem>>, vector<1x32xf32>
    %11 = vector.broadcast %10 : vector<1x32xf32> to vector<256x32xf32>
    %12 = arith.addf %9, %11 : vector<256x32xf32>
    %13 = math.tanh %12 : vector<256x32xf32>
    %c0_12 = arith.constant 0 : index
    %c0_13 = arith.constant 0 : index
    %14 = vector.load %arg5[%c0_12, %c0_13] : memref<32x32xf32, #tpu.memory_space<vmem>>, vector<32x32xf32>
    %cst_14 = arith.constant dense<0.000000e+00> : vector<256x32xf32>
    %15 = tpu.matmul %13, %14, %cst_14 {dimension_numbers = #tpu.dot_dimension_numbers<[1], [1], [0], [0], [0, 0, 1, 0], [], []>} : vector<256x32xf32>, vector<32x32xf32>, vector<256x32xf32> -> vector<256x32xf32>
    %c0_15 = arith.constant 0 : index
    %c0_16 = arith.constant 0 : index
    %16 = vector.load %arg9[%c0_15, %c0_16] : memref<1x32xf32, #tpu.memory_space<vmem>>, vector<1x32xf32>
    %17 = vector.broadcast %16 : vector<1x32xf32> to vector<256x32xf32>
    %18 = arith.addf %15, %17 : vector<256x32xf32>
    %19 = math.tanh %18 : vector<256x32xf32>
    %c0_17 = arith.constant 0 : index
    %c0_18 = arith.constant 0 : index
    %20 = vector.load %arg6[%c0_17, %c0_18] : memref<8x32xf32, #tpu.memory_space<vmem>>, vector<8x32xf32>
    %cst_19 = arith.constant dense<0.000000e+00> : vector<256x8xf32>
    %21 = tpu.matmul %19, %20, %cst_19 {dimension_numbers = #tpu.dot_dimension_numbers<[1], [1], [0], [0], [0, 0, 1, 0], [], []>} : vector<256x32xf32>, vector<8x32xf32>, vector<256x8xf32> -> vector<256x8xf32>
    %c0_20 = arith.constant 0 : index
    %c0_21 = arith.constant 0 : index
    %22 = vector.load %arg10[%c0_20, %c0_21] : memref<1x8xf32, #tpu.memory_space<vmem>>, vector<1x8xf32>
    %23 = vector.broadcast %22 : vector<1x8xf32> to vector<256x8xf32>
    %24 = arith.addf %21, %23 : vector<256x8xf32>
    %c0_22 = arith.constant 0 : index
    %c0_23 = arith.constant 0 : index
    %25 = vector.load %arg11[%c0_22, %c0_23] : memref<32x8xf32, #tpu.memory_space<vmem>>, vector<32x8xf32>
    %cst_24 = arith.constant dense<0.000000e+00> : vector<256x32xf32>
    %26 = tpu.matmul %0, %25, %cst_24 {dimension_numbers = #tpu.dot_dimension_numbers<[1], [1], [0], [0], [0, 0, 1, 0], [], []>} : vector<256x8xf32>, vector<32x8xf32>, vector<256x32xf32> -> vector<256x32xf32>
    %c0_25 = arith.constant 0 : index
    %c0_26 = arith.constant 0 : index
    %27 = vector.load %arg15[%c0_25, %c0_26] : memref<1x32xf32, #tpu.memory_space<vmem>>, vector<1x32xf32>
    %28 = vector.broadcast %27 : vector<1x32xf32> to vector<256x32xf32>
    %29 = arith.addf %26, %28 : vector<256x32xf32>
    %cst_27 = arith.constant 0.000000e+00 : f32
    %30 = vector.broadcast %cst_27 : f32 to vector<256x32xf32>
    %31 = arith.maximumf %29, %30 : vector<256x32xf32>
    %c0_28 = arith.constant 0 : index
    %c0_29 = arith.constant 0 : index
    %32 = vector.load %arg12[%c0_28, %c0_29] : memref<32x32xf32, #tpu.memory_space<vmem>>, vector<32x32xf32>
    %cst_30 = arith.constant dense<0.000000e+00> : vector<256x32xf32>
    %33 = tpu.matmul %31, %32, %cst_30 {dimension_numbers = #tpu.dot_dimension_numbers<[1], [1], [0], [0], [0, 0, 1, 0], [], []>} : vector<256x32xf32>, vector<32x32xf32>, vector<256x32xf32> -> vector<256x32xf32>
    %c0_31 = arith.constant 0 : index
    %c0_32 = arith.constant 0 : index
    %34 = vector.load %arg16[%c0_31, %c0_32] : memref<1x32xf32, #tpu.memory_space<vmem>>, vector<1x32xf32>
    %35 = vector.broadcast %34 : vector<1x32xf32> to vector<256x32xf32>
    %36 = arith.addf %33, %35 : vector<256x32xf32>
    %cst_33 = arith.constant 0.000000e+00 : f32
    %37 = vector.broadcast %cst_33 : f32 to vector<256x32xf32>
    %38 = arith.maximumf %36, %37 : vector<256x32xf32>
    %c0_34 = arith.constant 0 : index
    %c0_35 = arith.constant 0 : index
    %39 = vector.load %arg13[%c0_34, %c0_35] : memref<32x32xf32, #tpu.memory_space<vmem>>, vector<32x32xf32>
    %cst_36 = arith.constant dense<0.000000e+00> : vector<256x32xf32>
    %40 = tpu.matmul %38, %39, %cst_36 {dimension_numbers = #tpu.dot_dimension_numbers<[1], [1], [0], [0], [0, 0, 1, 0], [], []>} : vector<256x32xf32>, vector<32x32xf32>, vector<256x32xf32> -> vector<256x32xf32>
    %c0_37 = arith.constant 0 : index
    %c0_38 = arith.constant 0 : index
    %41 = vector.load %arg17[%c0_37, %c0_38] : memref<1x32xf32, #tpu.memory_space<vmem>>, vector<1x32xf32>
    %42 = vector.broadcast %41 : vector<1x32xf32> to vector<256x32xf32>
    %43 = arith.addf %40, %42 : vector<256x32xf32>
    %cst_39 = arith.constant 0.000000e+00 : f32
    %44 = vector.broadcast %cst_39 : f32 to vector<256x32xf32>
    %45 = arith.maximumf %43, %44 : vector<256x32xf32>
    %c0_40 = arith.constant 0 : index
    %c0_41 = arith.constant 0 : index
    %46 = vector.load %arg14[%c0_40, %c0_41] : memref<8x32xf32, #tpu.memory_space<vmem>>, vector<8x32xf32>
    %cst_42 = arith.constant dense<0.000000e+00> : vector<256x8xf32>
    %47 = tpu.matmul %45, %46, %cst_42 {dimension_numbers = #tpu.dot_dimension_numbers<[1], [1], [0], [0], [0, 0, 1, 0], [], []>} : vector<256x32xf32>, vector<8x32xf32>, vector<256x8xf32> -> vector<256x8xf32>
    %c0_43 = arith.constant 0 : index
    %c0_44 = arith.constant 0 : index
    %48 = vector.load %arg18[%c0_43, %c0_44] : memref<1x8xf32, #tpu.memory_space<vmem>>, vector<1x8xf32>
    %49 = vector.broadcast %48 : vector<1x8xf32> to vector<256x8xf32>
    %50 = arith.addf %47, %49 : vector<256x8xf32>
    %51 = vector.broadcast %1 : vector<1x8xf32> to vector<256x8xf32>
    %52 = arith.mulf %50, %51 : vector<256x8xf32>
    %53 = math.tanh %24 : vector<256x8xf32>
    %54 = vector.broadcast %1 : vector<1x8xf32> to vector<256x8xf32>
    %55 = arith.mulf %53, %54 : vector<256x8xf32>
    %56 = math.exp %55 : vector<256x8xf32>
    %57 = arith.mulf %0, %56 : vector<256x8xf32>
    %58 = arith.addf %57, %52 : vector<256x8xf32>
    %c0_45 = arith.constant 0 : index
    %c0_46 = arith.constant 0 : index
    %59 = vector.load %arg19[%c0_45, %c0_46] : memref<256x8xf32, #tpu.memory_space<vmem>>, vector<256x8xf32>
    tpu.vector_store %arg19[%c0_45, %c0_46], %58 {strides = array<i32>} : memref<256x8xf32, #tpu.memory_space<vmem>>, vector<256x8xf32>,
    %c0_47 = arith.constant 0 : index
    %c0_48 = arith.constant 0 : index
    %60 = vector.load %arg20[%c0_47, %c0_48] : memref<256x8xf32, #tpu.memory_space<vmem>>, vector<256x8xf32>
    tpu.vector_store %arg20[%c0_47, %c0_48], %55 {strides = array<i32>} : memref<256x8xf32, #tpu.memory_space<vmem>>, vector<256x8xf32>,
    return
  }
  func.func @transform_0(%arg0: i32) -> (i32, i32) {
    %c0_i32 = arith.constant 0 : i32
    %c0_i32_0 = arith.constant 0 : i32
    return %arg0, %c0_i32 : i32, i32
  }
  func.func @transform_1(%arg0: i32) -> (i32, i32) {
    %c0_i32 = arith.constant 0 : i32
    %c0_i32_0 = arith.constant 0 : i32
    %c0_i32_1 = arith.constant 0 : i32
    return %c0_i32, %c0_i32_0 : i32, i32
  }
  func.func @transform_2(%arg0: i32) -> (i32, i32) {
    %c0_i32 = arith.constant 0 : i32
    %c0_i32_0 = arith.constant 0 : i32
    %c0_i32_1 = arith.constant 0 : i32
    return %c0_i32, %c0_i32_0 : i32, i32
  }
  func.func @transform_3(%arg0: i32) -> (i32, i32) {
    %c0_i32 = arith.constant 0 : i32
    %c0_i32_0 = arith.constant 0 : i32
    %c0_i32_1 = arith.constant 0 : i32
    return %c0_i32, %c0_i32_0 : i32, i32
  }
  func.func @transform_4(%arg0: i32) -> (i32, i32) {
    %c0_i32 = arith.constant 0 : i32
    %c0_i32_0 = arith.constant 0 : i32
    %c0_i32_1 = arith.constant 0 : i32
    return %c0_i32, %c0_i32_0 : i32, i32
  }
  func.func @transform_5(%arg0: i32) -> (i32, i32) {
    %c0_i32 = arith.constant 0 : i32
    %c0_i32_0 = arith.constant 0 : i32
    %c0_i32_1 = arith.constant 0 : i32
    return %c0_i32, %c0_i32_0 : i32, i32
  }
  func.func @transform_6(%arg0: i32) -> (i32, i32) {
    %c0_i32 = arith.constant 0 : i32
    %c0_i32_0 = arith.constant 0 : i32
    %c0_i32_1 = arith.constant 0 : i32
    return %c0_i32, %c0_i32_0 : i32, i32
  }
  func.func @transform_7(%arg0: i32) -> (i32, i32) {
    %c0_i32 = arith.constant 0 : i32
    %c0_i32_0 = arith.constant 0 : i32
    %c0_i32_1 = arith.constant 0 : i32
    return %c0_i32, %c0_i32_0 : i32, i32
  }
  func.func @transform_8(%arg0: i32) -> (i32, i32) {
    %c0_i32 = arith.constant 0 : i32
    %c0_i32_0 = arith.constant 0 : i32
    %c0_i32_1 = arith.constant 0 : i32
    return %c0_i32, %c0_i32_0 : i32, i32
  }
  func.func @transform_9(%arg0: i32) -> (i32, i32) {
    %c0_i32 = arith.constant 0 : i32
    %c0_i32_0 = arith.constant 0 : i32
    %c0_i32_1 = arith.constant 0 : i32
    return %c0_i32, %c0_i32_0 : i32, i32
  }
  func.func @transform_10(%arg0: i32) -> (i32, i32) {
    %c0_i32 = arith.constant 0 : i32
    %c0_i32_0 = arith.constant 0 : i32
    %c0_i32_1 = arith.constant 0 : i32
    return %c0_i32, %c0_i32_0 : i32, i32
  }
  func.func @transform_11(%arg0: i32) -> (i32, i32) {
    %c0_i32 = arith.constant 0 : i32
    %c0_i32_0 = arith.constant 0 : i32
    %c0_i32_1 = arith.constant 0 : i32
    return %c0_i32, %c0_i32_0 : i32, i32
  }
  func.func @transform_12(%arg0: i32) -> (i32, i32) {
    %c0_i32 = arith.constant 0 : i32
    %c0_i32_0 = arith.constant 0 : i32
    %c0_i32_1 = arith.constant 0 : i32
    return %c0_i32, %c0_i32_0 : i32, i32
  }
  func.func @transform_13(%arg0: i32) -> (i32, i32) {
    %c0_i32 = arith.constant 0 : i32
    %c0_i32_0 = arith.constant 0 : i32
    %c0_i32_1 = arith.constant 0 : i32
    return %c0_i32, %c0_i32_0 : i32, i32
  }
  func.func @transform_14(%arg0: i32) -> (i32, i32) {
    %c0_i32 = arith.constant 0 : i32
    %c0_i32_0 = arith.constant 0 : i32
    %c0_i32_1 = arith.constant 0 : i32
    return %c0_i32, %c0_i32_0 : i32, i32
  }
  func.func @transform_15(%arg0: i32) -> (i32, i32) {
    %c0_i32 = arith.constant 0 : i32
    %c0_i32_0 = arith.constant 0 : i32
    %c0_i32_1 = arith.constant 0 : i32
    return %c0_i32, %c0_i32_0 : i32, i32
  }
  func.func @transform_16(%arg0: i32) -> (i32, i32) {
    %c0_i32 = arith.constant 0 : i32
    %c0_i32_0 = arith.constant 0 : i32
    %c0_i32_1 = arith.constant 0 : i32
    return %c0_i32, %c0_i32_0 : i32, i32
  }
  func.func @transform_17(%arg0: i32) -> (i32, i32) {
    %c0_i32 = arith.constant 0 : i32
    %c0_i32_0 = arith.constant 0 : i32
    %c0_i32_1 = arith.constant 0 : i32
    return %c0_i32, %c0_i32_0 : i32, i32
  }
  func.func @transform_18(%arg0: i32) -> (i32, i32) {
    %c0_i32 = arith.constant 0 : i32
    %c0_i32_0 = arith.constant 0 : i32
    return %arg0, %c0_i32 : i32, i32
  }
  func.func @transform_19(%arg0: i32) -> (i32, i32) {
    %c0_i32 = arith.constant 0 : i32
    %c0_i32_0 = arith.constant 0 : i32
    return %arg0, %c0_i32 : i32, i32
  }
}

</mosaic_0001>

<bundles_post_ra>
// kernel: tpu_custom_call.1
= control target key start
LH: loop header
LB: loop body
LE: loop exit
PB: predicated region body
PF: predicated region fallthrough
CT: control target
= control target key end

     0   :  { %vm105_vm0 = vcmask 64512   ;;  %vm482_vm1 = vcmask 261120   ;;  %s6144_s2 = inlined_call_operand.vmem [shape: f32[32,8], index: 2, kind: input, shape index: {}]   ;;  %s6145_s0 = inlined_call_operand.vmem [shape: f32[256,8], index: 0, kind: input, shape index: {}]   ;;  %s6146_s3 = inlined_call_operand.vmem [shape: f32[32,32], index: 3, kind: input, shape index: {}]   ;;  %s6147_s4 = inlined_call_operand.vmem [shape: f32[32,32], index: 4, kind: input, shape index: {}]   ;;  %s6148_s6 = inlined_call_operand.vmem [shape: f32[1,32], index: 6, kind: input, shape index: {}]   ;;  %s6149_s10 = inlined_call_operand.vmem [shape: f32[32,8], index: 10, kind: input, shape index: {}]   ;;  %s6150_s7 = inlined_call_operand.vmem [shape: f32[1,32], index: 7, kind: input, shape index: {}]   ;;  %s6151_s5 = inlined_call_operand.vmem [shape: f32[8,32], index: 5, kind: input, shape index: {}]   ;;  %s6152_s11 = inlined_call_operand.vmem [shape: f32[32,32], index: 11, kind: input, shape index: {}]   ;;  %s6153_s8 = inlined_call_operand.vmem [shape: f32[1,32], index: 8, kind: input, shape index: {}]   ;;  %s6154_s14 = inlined_call_operand.vmem [shape: f32[1,32], index: 14, kind: input, shape index: {}]   ;;  %s6155_s12 = inlined_call_operand.vmem [shape: f32[32,32], index: 12, kind: input, shape index: {}]   ;;  %s6156_s9 = inlined_call_operand.vmem [shape: f32[1,8], index: 9, kind: input, shape index: {}]   ;;  %s6157_s13 = inlined_call_operand.vmem [shape: f32[8,32], index: 13, kind: input, shape index: {}]   ;;  %s6158_s1 = inlined_call_operand.vmem [shape: f32[1,8], index: 1, kind: input, shape index: {}]   ;;  %s6159_s19 = inlined_call_operand.vmem [shape: f32[256,8], index: 19, kind: output, shape index: {1}]   ;;  %s6160_s15 = inlined_call_operand.vmem [shape: f32[1,32], index: 15, kind: input, shape index: {}]   ;;  %s6161_s16 = inlined_call_operand.vmem [shape: f32[1,32], index: 16, kind: input, shape index: {}]   ;;  %s6162_s17 = inlined_call_operand.vmem [shape: f32[1,8], index: 17, kind: input, shape index: {}]   ;;  %s6163_s18 = inlined_call_operand.vmem [shape: f32[256,8], index: 18, kind: output, shape index: {0}]  }
   0x1   :  { %6168 = sst [smem:[#allocation2_spill]] %s6144_s2  ;;  %v4966_v43 = vld [vmem:[%s6148_s6] ss:$0 sm:$0xff] }
   0x2   :  { %6169 = sst [smem:[#allocation3_spill]] %s6145_s0 }
   0x3   :  { %6170 = sst [smem:[#allocation4_spill]] %s6146_s3 }
   0x4   :  { %6171 = sst [smem:[#allocation5_spill]] %s6147_s4 }
   0x5   :  { %s6172_s20 = sld [smem:[#allocation2_spill]] }
   0x6   :  { %s6173_s23 = sld [smem:[#allocation3_spill]] }
   0x7   :  { %s6174_s22 = sld [smem:[#allocation4_spill]] }
   0x8   :  { %s6175_s2 = sld [smem:[#allocation5_spill]] }
   0xb   :  { %v97_v0 = vld [vmem:[%s6172_s20 + $0x18] sm:$0xff]  ;;  %v96_v1 = vld [vmem:[%s6172_s20 + $0x10] sm:$0xff]  ;;  %v95_v3 = vld [vmem:[%s6172_s20 + $0x8] sm:$0xff] }
   0xc   :  { %3795 = vmatprep.subr.msk.mxu0 %vm105_vm0, %v97_v0  ;;  %v4694_v2 = vld [vmem:[%s6173_s23] sm:$0xff]  ;;  %v4714_v5 = vld [vmem:[%s6173_s23 + $0x8] sm:$0xff]  ;;  %v4719_v6 = vld [vmem:[%s6173_s23 + $0x10] sm:$0xff] }
   0xd   :  { %3796 = vmatpush3.xpose.msk.msra.mxu0 %vm105_vm0, %v97_v0  ;;  %3803 = vmatprep.mubr.msk.f32.mxu0 %vm105_vm0, %v4694_v2  ;;  %v94_v4 = vld [vmem:[%s6172_s20] sm:$0xff]  ;;  %v4728_v7 = vld [vmem:[%s6173_s23 + $0x18] sm:$0xff]  ;;  %v4742_v9 = vld [vmem:[%s6173_s23 + $0x28] sm:$0xff] }
   0xe   :  { %3797 = vmatprep.subr.msk.mxu0 %vm105_vm0, %v96_v1  ;;  %v4733_v8 = vld [vmem:[%s6173_s23 + $0x20] sm:$0xff]  ;;  %v4747_v10 = vld [vmem:[%s6173_s23 + $0x30] sm:$0xff]  ;;  %v4756_v11 = vld [vmem:[%s6173_s23 + $0x38] sm:$0xff] }
   0xf   :  { %v4761_v12 = vld [vmem:[%s6173_s23 + $0x40] sm:$0xff]  ;;  %v4770_v13 = vld [vmem:[%s6173_s23 + $0x48] sm:$0xff]  ;;  %v4775_v14 = vld [vmem:[%s6173_s23 + $0x50] sm:$0xff] }
  0x10   :  { %v4784_v15 = vld [vmem:[%s6173_s23 + $0x58] sm:$0xff]  ;;  %v4789_v16 = vld [vmem:[%s6173_s23 + $0x60] sm:$0xff]  ;;  %v4798_v17 = vld [vmem:[%s6173_s23 + $0x68] sm:$0xff] }
  0x11   :  { %3798 = vmatpush3.xpose.msk.msra.mxu0 %vm105_vm0, %v96_v1  ;;  %v4803_v18 = vld [vmem:[%s6173_s23 + $0x70] sm:$0xff]  ;;  %v4812_v19 = vld [vmem:[%s6173_s23 + $0x78] sm:$0xff]  ;;  %v4817_v20 = vld [vmem:[%s6173_s23 + $0x80] sm:$0xff] }
  0x12   :  { %3799 = vmatprep.subr.msk.mxu0 %vm105_vm0, %v95_v3  ;;  %v4826_v21 = vld [vmem:[%s6173_s23 + $0x88] sm:$0xff]  ;;  %v4831_v22 = vld [vmem:[%s6173_s23 + $0x90] sm:$0xff]  ;;  %v4840_v23 = vld [vmem:[%s6173_s23 + $0x98] sm:$0xff] }
  0x13   :  { %v4845_v24 = vld [vmem:[%s6173_s23 + $0xa0] sm:$0xff]  ;;  %v4854_v25 = vld [vmem:[%s6173_s23 + $0xa8] sm:$0xff]  ;;  %v4859_v26 = vld [vmem:[%s6173_s23 + $0xb0] sm:$0xff] }
  0x14   :  { %v4868_v27 = vld [vmem:[%s6173_s23 + $0xb8] sm:$0xff]  ;;  %v4873_v28 = vld [vmem:[%s6173_s23 + $0xc0] sm:$0xff]  ;;  %v4882_v29 = vld [vmem:[%s6173_s23 + $0xc8] sm:$0xff] }
  0x15   :  { %3800 = vmatpush3.xpose.msk.msra.mxu0 %vm105_vm0, %v95_v3  ;;  %v4887_v30 = vld [vmem:[%s6173_s23 + $0xd0] sm:$0xff]  ;;  %v4896_v31 = vld [vmem:[%s6173_s23 + $0xd8] sm:$0xff]  ;;  %v4901_v32 = vld [vmem:[%s6173_s23 + $0xe0] sm:$0xff] }
  0x16   :  { %3801 = vmatprep.subr.msk.mxu0 %vm105_vm0, %v94_v4  ;;  %v4910_v33 = vld [vmem:[%s6173_s23 + $0xe8] sm:$0xff]  ;;  %v4915_v34 = vld [vmem:[%s6173_s23 + $0xf0] sm:$0xff]  ;;  %v4924_v35 = vld [vmem:[%s6173_s23 + $0xf8] sm:$0xff] }
  0x17   :  { %v474_v36 = vld [vmem:[%s6174_s22 + $0x18] sm:$0xff]  ;;  %v473_v37 = vld [vmem:[%s6174_s22 + $0x10] sm:$0xff]  ;;  %v472_v38 = vld [vmem:[%s6174_s22 + $0x8] sm:$0xff] }
  0x18   :  { %3851 = vmatprep.subr.msk.mxu1 %vm482_vm1, %v474_v36  ;;  %v471_v39 = vld [vmem:[%s6174_s22] sm:$0xff]  ;;  %v851_v40 = vld [vmem:[%s6175_s2 + $0x18] sm:$0xff]  ;;  %v850_v41 = vld [vmem:[%s6175_s2 + $0x10] sm:$0xff] }
  0x19   :  { %3802 = vmatpush3.xpose.msk.msra.mxu0 %vm105_vm0, %v94_v4  ;;  %3852 = vmatpush3.xpose.msk.msra.mxu1 %vm482_vm1, %v474_v36  ;;  %v849_v42 = vld [vmem:[%s6175_s2 + $0x8] sm:$0xff] }
  0x1a   :  { %3853 = vmatprep.subr.msk.mxu1 %vm482_vm1, %v473_v37  ;;  %3907 = vmatprep.subr.msk.mxu0 %vm482_vm1, %v851_v40 }
  0x1c   :  { %3804 = vmatmul.mubr.msk.f32.vlgmr.msra.gmra.mxu0 %vm105_vm0, %v4714_v5 }
  0x1d   :  { %3806 = vmatprep.mubr.msk.f32.mxu0 %vm105_vm0, %v4719_v6  ;;  %3854 = vmatpush3.xpose.msk.msra.mxu1 %vm482_vm1, %v473_v37 }
  0x1e   :  { %3855 = vmatprep.subr.msk.mxu1 %vm482_vm1, %v472_v38  ;;  %3908 = vmatpush3.xpose.msk.msra.mxu0 %vm482_vm1, %v851_v40 }
  0x1f   :  { %3909 = vmatprep.subr.msk.mxu0 %vm482_vm1, %v850_v41 }
  0x20   :  { %3807 = vmatmul.mubr.msk.f32.gmra.mxu0 %vm105_vm0, %v4728_v7 }
  0x21   :  { %3809 = vmatprep.mubr.msk.f32.mxu0 %vm105_vm0, %v4733_v8  ;;  %3856 = vmatpush3.xpose.msk.msra.mxu1 %vm482_vm1, %v472_v38 }
  0x22   :  { %3857 = vmatprep.subr.msk.mxu1 %vm482_vm1, %v471_v39  ;;  %3910 = vmatpush3.xpose.msk.msra.mxu0 %vm482_vm1, %v850_v41 }
  0x23   :  { %3911 = vmatprep.subr.msk.mxu0 %vm482_vm1, %v849_v42 }
  0x24   :  { %3810 = vmatmul.mubr.msk.f32.gmra.mxu0 %vm105_vm0, %v4742_v9 }
  0x25   :  { %3812 = vmatprep.mubr.msk.f32.mxu0 %vm105_vm0, %v4747_v10  ;;  %3858 = vmatpush3.xpose.msk.msra.mxu1 %vm482_vm1, %v471_v39 }
  0x26   :  { %3912 = vmatpush3.xpose.msk.msra.mxu0 %vm482_vm1, %v849_v42 }
  0x28   :  { %3813 = vmatmul.mubr.msk.f32.gmra.mxu0 %vm105_vm0, %v4756_v11 }
  0x29   :  { %3815 = vmatprep.mubr.msk.f32.mxu0 %vm105_vm0, %v4761_v12 }
  0x2c   :  { %3816 = vmatmul.mubr.msk.f32.gmra.mxu0 %vm105_vm0, %v4770_v13 }
  0x2d   :  { %3818 = vmatprep.mubr.msk.f32.mxu0 %vm105_vm0, %v4775_v14 }
  0x30   :  { %3819 = vmatmul.mubr.msk.f32.gmra.mxu0 %vm105_vm0, %v4784_v15 }
  0x31   :  { %3821 = vmatprep.mubr.msk.f32.mxu0 %vm105_vm0, %v4789_v16 }
  0x34   :  { %3822 = vmatmul.mubr.msk.f32.gmra.mxu0 %vm105_vm0, %v4798_v17 }
  0x35   :  { %3824 = vmatprep.mubr.msk.f32.mxu0 %vm105_vm0, %v4803_v18 }
  0x38   :  { %3825 = vmatmul.mubr.msk.f32.gmra.mxu0 %vm105_vm0, %v4812_v19 }
  0x39   :  { %3827 = vmatprep.mubr.msk.f32.mxu0 %vm105_vm0, %v4817_v20 }
  0x3c   :  { %3828 = vmatmul.mubr.msk.f32.gmra.mxu0 %vm105_vm0, %v4826_v21 }
  0x3d   :  { %3830 = vmatprep.mubr.msk.f32.mxu0 %vm105_vm0, %v4831_v22 }
  0x40   :  { %3831 = vmatmul.mubr.msk.f32.gmra.mxu0 %vm105_vm0, %v4840_v23 }
  0x41   :  { %3833 = vmatprep.mubr.msk.f32.mxu0 %vm105_vm0, %v4845_v24 }
  0x44   :  { %3834 = vmatmul.mubr.msk.f32.gmra.mxu0 %vm105_vm0, %v4854_v25 }
  0x45   :  { %3836 = vmatprep.mubr.msk.f32.mxu0 %vm105_vm0, %v4859_v26 }
  0x48   :  { %3837 = vmatmul.mubr.msk.f32.gmra.mxu0 %vm105_vm0, %v4868_v27 }
  0x49   :  { %3839 = vmatprep.mubr.msk.f32.mxu0 %vm105_vm0, %v4873_v28 }
  0x4c   :  { %3840 = vmatmul.mubr.msk.f32.gmra.mxu0 %vm105_vm0, %v4882_v29 }
  0x4d   :  { %3842 = vmatprep.mubr.msk.f32.mxu0 %vm105_vm0, %v4887_v30 }
  0x50   :  { %3843 = vmatmul.mubr.msk.f32.gmra.mxu0 %vm105_vm0, %v4896_v31 }
  0x51   :  { %3845 = vmatprep.mubr.msk.f32.mxu0 %vm105_vm0, %v4901_v32 }
  0x54   :  { %3846 = vmatmul.mubr.msk.f32.gmra.mxu0 %vm105_vm0, %v4910_v33 }
  0x55   :  { %3848 = vmatprep.mubr.msk.f32.mxu0 %vm105_vm0, %v4915_v34 }
  0x58   :  { %3849 = vmatmul.mubr.msk.f32.gmra.mxu0 %vm105_vm0, %v4924_v35 }
  0xdc   :  { %v3805_v44 = vpop.f32.mrf.mxu0 }
  0xdd   :  { %v286_v45 = vadd.f32 %v3805_v44, %v4966_v43 }
  0xde   :  { %v280_v46 = vpop.f32.mrf.mxu0 }
  0xdf   :  { %v281_v47 = vadd.f32 %v4966_v43, %v280_v46 }
  0xe0   :  { %v3808_v48 = vpop.f32.mrf.mxu0 }
  0xe1   :  { %4231 = vtanh.f32 %v281_v47  ;;  %v296_v49 = vadd.f32 %v3808_v48, %v4966_v43 }
  0xe2   :  { %4233 = vtanh.f32 %v286_v45  ;;  %v290_v50 = vpop.f32.mrf.mxu0 }
  0xe3   :  { %v291_v51 = vadd.f32 %v4966_v43, %v290_v50 }
  0xe4   :  { %v3811_v52 = vpop.f32.mrf.mxu0 }
  0xe5   :  { %4235 = vtanh.f32 %v291_v51  ;;  %v306_v53 = vadd.f32 %v3811_v52, %v4966_v43 }
  0xe6   :  { %4237 = vtanh.f32 %v296_v49  ;;  %v300_v54 = vpop.f32.mrf.mxu0 }
  0xe7   :  { %v301_v55 = vadd.f32 %v4966_v43, %v300_v54 }
  0xe8   :  { %v3814_v56 = vpop.f32.mrf.mxu0 }
  0xe9   :  { %4239 = vtanh.f32 %v301_v55  ;;  %v316_v57 = vadd.f32 %v3814_v56, %v4966_v43 }
  0xea   :  { %4241 = vtanh.f32 %v306_v53  ;;  %v310_v58 = vpop.f32.mrf.mxu0 }
  0xeb   :  { %v311_v59 = vadd.f32 %v4966_v43, %v310_v58 }
  0xec   :  { %v3817_v60 = vpop.f32.mrf.mxu0 }
  0xed   :  { %4243 = vtanh.f32 %v311_v59  ;;  %v326_v62 = vadd.f32 %v3817_v60, %v4966_v43 }
  0xee   :  { %v4232_v61 = vpop.eup %4231  ;;  %4245 = vtanh.f32 %v316_v57  ;;  %v320_v63 = vpop.f32.mrf.mxu0 }
  0xef   :  { %v4234_v0 = vpop.eup %4233  ;;  %v321_v1 = vadd.f32 %v4966_v43, %v320_v63  ;;  %3859 = vmatprep.mubr.msk.f32.mxu1 %vm482_vm1, %v4232_v61 }
  0xf0   :  { %v3820_v3 = vpop.f32.mrf.mxu0  ;;  %3860 = vmatmul.mubr.msk.f32.vlgmr.msra.gmra.mxu1 %vm482_vm1, %v4234_v0 }
  0xf1   :  { %4247 = vtanh.f32 %v321_v1  ;;  %v336_v36 = vadd.f32 %v3820_v3, %v4966_v43 }
  0xf2   :  { %v4236_v4 = vpop.eup %4235  ;;  %4249 = vtanh.f32 %v326_v62  ;;  %v330_v37 = vpop.f32.mrf.mxu0 }
  0xf3   :  { %v4238_v38 = vpop.eup %4237  ;;  %v331_v39 = vadd.f32 %v4966_v43, %v330_v37  ;;  %3862 = vmatprep.mubr.msk.f32.mxu1 %vm482_vm1, %v4236_v4 }
  0xf4   :  { %v3823_v40 = vpop.f32.mrf.mxu0  ;;  %3863 = vmatmul.mubr.msk.f32.gmra.mxu1 %vm482_vm1, %v4238_v38 }
  0xf5   :  { %4251 = vtanh.f32 %v331_v39  ;;  %v346_v42 = vadd.f32 %v3823_v40, %v4966_v43 }
  0xf6   :  { %v4240_v41 = vpop.eup %4239  ;;  %4253 = vtanh.f32 %v336_v36  ;;  %v340_v44 = vpop.f32.mrf.mxu0 }
  0xf7   :  { %v4242_v45 = vpop.eup %4241  ;;  %v341_v46 = vadd.f32 %v4966_v43, %v340_v44  ;;  %3865 = vmatprep.mubr.msk.f32.mxu1 %vm482_vm1, %v4240_v41 }
  0xf8   :  { %v3826_v47 = vpop.f32.mrf.mxu0  ;;  %3866 = vmatmul.mubr.msk.f32.gmra.mxu1 %vm482_vm1, %v4242_v45 }
  0xf9   :  { %4255 = vtanh.f32 %v341_v46  ;;  %v356_v49 = vadd.f32 %v3826_v47, %v4966_v43 }
  0xfa   :  { %v4244_v48 = vpop.eup %4243  ;;  %4257 = vtanh.f32 %v346_v42  ;;  %v350_v50 = vpop.f32.mrf.mxu0 }
  0xfb   :  { %v4246_v51 = vpop.eup %4245  ;;  %v351_v52 = vadd.f32 %v4966_v43, %v350_v50  ;;  %3868 = vmatprep.mubr.msk.f32.mxu1 %vm482_vm1, %v4244_v48 }
  0xfc   :  { %v3829_v53 = vpop.f32.mrf.mxu0  ;;  %3869 = vmatmul.mubr.msk.f32.gmra.mxu1 %vm482_vm1, %v4246_v51 }
  0xfd   :  { %4259 = vtanh.f32 %v351_v52  ;;  %v366_v55 = vadd.f32 %v3829_v53, %v4966_v43 }
  0xfe   :  { %v4248_v54 = vpop.eup %4247  ;;  %4261 = vtanh.f32 %v356_v49  ;;  %v360_v56 = vpop.f32.mrf.mxu0 }
  0xff   :  { %v4250_v57 = vpop.eup %4249  ;;  %v361_v58 = vadd.f32 %v4966_v43, %v360_v56  ;;  %3871 = vmatprep.mubr.msk.f32.mxu1 %vm482_vm1, %v4248_v54 }
 0x100   :  { %v3832_v59 = vpop.f32.mrf.mxu0  ;;  %3872 = vmatmul.mubr.msk.f32.gmra.mxu1 %vm482_vm1, %v4250_v57 }
 0x101   :  { %4263 = vtanh.f32 %v361_v58  ;;  %v376_v61 = vadd.f32 %v3832_v59, %v4966_v43 }
 0x102   :  { %v4252_v60 = vpop.eup %4251  ;;  %4265 = vtanh.f32 %v366_v55  ;;  %v370_v62 = vpop.f32.mrf.mxu0 }
 0x103   :  { %v4254_v63 = vpop.eup %4253  ;;  %v371_v0 = vadd.f32 %v4966_v43, %v370_v62  ;;  %3874 = vmatprep.mubr.msk.f32.mxu1 %vm482_vm1, %v4252_v60 }
 0x104   :  { %v3835_v1 = vpop.f32.mrf.mxu0  ;;  %3875 = vmatmul.mubr.msk.f32.gmra.mxu1 %vm482_vm1, %v4254_v63 }
 0x105   :  { %4267 = vtanh.f32 %v371_v0  ;;  %v386_v4 = vadd.f32 %v3835_v1, %v4966_v43 }
 0x106   :  { %v4256_v3 = vpop.eup %4255  ;;  %4269 = vtanh.f32 %v376_v61  ;;  %v380_v36 = vpop.f32.mrf.mxu0 }
 0x107   :  { %v4258_v37 = vpop.eup %4257  ;;  %v381_v38 = vadd.f32 %v4966_v43, %v380_v36  ;;  %3877 = vmatprep.mubr.msk.f32.mxu1 %vm482_vm1, %v4256_v3 }
 0x108   :  { %v3838_v39 = vpop.f32.mrf.mxu0  ;;  %3878 = vmatmul.mubr.msk.f32.gmra.mxu1 %vm482_vm1, %v4258_v37 }
 0x109   :  { %4271 = vtanh.f32 %v381_v38  ;;  %v396_v41 = vadd.f32 %v3838_v39, %v4966_v43 }
 0x10a   :  { %v4260_v40 = vpop.eup %4259  ;;  %4273 = vtanh.f32 %v386_v4  ;;  %v390_v42 = vpop.f32.mrf.mxu0 }
 0x10b   :  { %v4262_v44 = vpop.eup %4261  ;;  %v391_v45 = vadd.f32 %v4966_v43, %v390_v42  ;;  %3880 = vmatprep.mubr.msk.f32.mxu1 %vm482_vm1, %v4260_v40 }
 0x10c   :  { %v3841_v46 = vpop.f32.mrf.mxu0  ;;  %3881 = vmatmul.mubr.msk.f32.gmra.mxu1 %vm482_vm1, %v4262_v44 }
 0x10d   :  { %4275 = vtanh.f32 %v391_v45  ;;  %v406_v48 = vadd.f32 %v3841_v46, %v4966_v43  ;;  %v848_v46 = vld [vmem:[%s6175_s2] sm:$0xff] }
 0x10e   :  { %v4264_v47 = vpop.eup %4263  ;;  %4277 = vtanh.f32 %v396_v41  ;;  %v400_v49 = vpop.f32.mrf.mxu0  ;;  %3913 = vmatprep.subr.msk.mxu0 %vm482_vm1, %v848_v46 }
 0x10f   :  { %v4266_v50 = vpop.eup %4265  ;;  %v401_v51 = vadd.f32 %v4966_v43, %v400_v49  ;;  %3883 = vmatprep.mubr.msk.f32.mxu1 %vm482_vm1, %v4264_v47  ;;  %3914 = vmatpush3.xpose.msk.msra.mxu0 %vm482_vm1, %v848_v46  ;;  %v1559_v47 = vld [vmem:[%s6149_s10 + $0x18] sm:$0xff] }
 0x110   :  { %v3844_v52 = vpop.f32.mrf.mxu0  ;;  %3884 = vmatmul.mubr.msk.f32.gmra.mxu1 %vm482_vm1, %v4266_v50  ;;  %4013 = vmatprep.subr.msk.mxu0 %vm105_vm0, %v1559_v47 }
 0x111   :  { %4279 = vtanh.f32 %v401_v51  ;;  %v416_v54 = vadd.f32 %v3844_v52, %v4966_v43 }
 0x112   :  { %v4268_v53 = vpop.eup %4267  ;;  %4281 = vtanh.f32 %v406_v48  ;;  %v410_v55 = vpop.f32.mrf.mxu0  ;;  %v5044_v48 = vld [vmem:[%s6150_s7] ss:$0 sm:$0xff] }
 0x113   :  { %v4270_v56 = vpop.eup %4269  ;;  %v411_v57 = vadd.f32 %v4966_v43, %v410_v55  ;;  %3886 = vmatprep.mubr.msk.f32.mxu1 %vm482_vm1, %v4268_v53 }
 0x114   :  { %v3847_v58 = vpop.f32.mrf.mxu0  ;;  %3887 = vmatmul.mubr.msk.f32.gmra.mxu1 %vm482_vm1, %v4270_v56 }
 0x115   :  { %4283 = vtanh.f32 %v411_v57  ;;  %v426_v60 = vadd.f32 %v3847_v58, %v4966_v43 }
 0x116   :  { %v4272_v59 = vpop.eup %4271  ;;  %4285 = vtanh.f32 %v416_v54  ;;  %v420_v61 = vpop.f32.mrf.mxu0 }
 0x117   :  { %v4274_v62 = vpop.eup %4273  ;;  %v421_v63 = vadd.f32 %v4966_v43, %v420_v61  ;;  %3889 = vmatprep.mubr.msk.f32.mxu1 %vm482_vm1, %v4272_v59 }
 0x118   :  { %v3850_v0 = vpop.f32.mrf.mxu0  ;;  %3890 = vmatmul.mubr.msk.f32.gmra.mxu1 %vm482_vm1, %v4274_v62 }
 0x119   :  { %4287 = vtanh.f32 %v421_v63  ;;  %v436_v3 = vadd.f32 %v3850_v0, %v4966_v43 }
 0x11a   :  { %v4276_v1 = vpop.eup %4275  ;;  %4289 = vtanh.f32 %v426_v60  ;;  %v430_v4 = vpop.f32.mrf.mxu0 }
 0x11b   :  { %v4278_v36 = vpop.eup %4277  ;;  %v431_v37 = vadd.f32 %v4966_v43, %v430_v4  ;;  %3892 = vmatprep.mubr.msk.f32.mxu1 %vm482_vm1, %v4276_v1 }
 0x11c   :  { %3893 = vmatmul.mubr.msk.f32.gmra.mxu1 %vm482_vm1, %v4278_v36 }
 0x11d   :  { %4291 = vtanh.f32 %v431_v37 }
 0x11e   :  { %v4280_v38 = vpop.eup %4279  ;;  %4293 = vtanh.f32 %v436_v3  ;;  %v1224_v3 = vld [vmem:[%s6151_s5] sm:$0xff] }
 0x11f   :  { %v4282_v39 = vpop.eup %4281  ;;  %3895 = vmatprep.mubr.msk.f32.mxu1 %vm482_vm1, %v4280_v38  ;;  %3963 = vmatprep.subr.msk.mxu1 %vm482_vm1, %v1224_v3 }
 0x120   :  { %3896 = vmatmul.mubr.msk.f32.gmra.mxu1 %vm482_vm1, %v4282_v39 }
 0x121   :  { %3964 = vmatpush3.xpose.msk.msra.mxu1 %vm482_vm1, %v1224_v3 }
 0x122   :  { %v4284_v40 = vpop.eup %4283 }
 0x123   :  { %v4286_v41 = vpop.eup %4285  ;;  %3898 = vmatprep.mubr.msk.f32.mxu1 %vm482_vm1, %v4284_v40  ;;  %v1558_v40 = vld [vmem:[%s6149_s10 + $0x10] sm:$0xff] }
 0x124   :  { %3899 = vmatmul.mubr.msk.f32.gmra.mxu1 %vm482_vm1, %v4286_v41 }
 0x126   :  { %v4288_v42 = vpop.eup %4287 }
 0x127   :  { %v4290_v43 = vpop.eup %4289  ;;  %3901 = vmatprep.mubr.msk.f32.mxu1 %vm482_vm1, %v4288_v42 }
 0x128   :  { %3902 = vmatmul.mubr.msk.f32.gmra.mxu1 %vm482_vm1, %v4290_v43 }
 0x12a   :  { %v4292_v44 = vpop.eup %4291 }
 0x12b   :  { %v4294_v45 = vpop.eup %4293  ;;  %3904 = vmatprep.mubr.msk.f32.mxu1 %vm482_vm1, %v4292_v44 }
 0x12c   :  { %3905 = vmatmul.mubr.msk.f32.gmra.mxu1 %vm482_vm1, %v4294_v45 }
 0x1b0   :  { %v3861_v49 = vpop.f32.mrf.mxu1 }
 0x1b1   :  { %v663_v50 = vadd.f32 %v3861_v49, %v5044_v48  ;;  %v1557_v49 = vld [vmem:[%s6149_s10 + $0x8] sm:$0xff] }
 0x1b2   :  { %v657_v51 = vpop.f32.mrf.mxu1 }
 0x1b3   :  { %v658_v52 = vadd.f32 %v5044_v48, %v657_v51 }
 0x1b4   :  { %v3864_v53 = vpop.f32.mrf.mxu1 }
 0x1b5   :  { %4295 = vtanh.f32 %v658_v52  ;;  %v673_v54 = vadd.f32 %v3864_v53, %v5044_v48 }
 0x1b6   :  { %4297 = vtanh.f32 %v663_v50  ;;  %v667_v55 = vpop.f32.mrf.mxu1 }
 0x1b7   :  { %v668_v56 = vadd.f32 %v5044_v48, %v667_v55  ;;  %v1556_v55 = vld [vmem:[%s6149_s10] sm:$0xff] }
 0x1b8   :  { %v3867_v57 = vpop.f32.mrf.mxu1 }
 0x1b9   :  { %4299 = vtanh.f32 %v668_v56  ;;  %v683_v58 = vadd.f32 %v3867_v57, %v5044_v48 }
 0x1ba   :  { %4301 = vtanh.f32 %v673_v54  ;;  %v677_v59 = vpop.f32.mrf.mxu1 }
 0x1bb   :  { %v678_v60 = vadd.f32 %v5044_v48, %v677_v59 }
 0x1bc   :  { %v3870_v61 = vpop.f32.mrf.mxu1 }
 0x1bd   :  { %4303 = vtanh.f32 %v678_v60  ;;  %v693_v62 = vadd.f32 %v3870_v61, %v5044_v48 }
 0x1be   :  { %4305 = vtanh.f32 %v683_v58  ;;  %v687_v63 = vpop.f32.mrf.mxu1 }
 0x1bf   :  { %v688_v0 = vadd.f32 %v5044_v48, %v687_v63 }
 0x1c0   :  { %v3873_v1 = vpop.f32.mrf.mxu1 }
 0x1c1   :  { %4307 = vtanh.f32 %v688_v0  ;;  %v703_v36 = vadd.f32 %v3873_v1, %v5044_v48 }
 0x1c2   :  { %v4296_v4 = vpop.eup %4295  ;;  %4309 = vtanh.f32 %v693_v62  ;;  %v697_v37 = vpop.f32.mrf.mxu1 }
 0x1c3   :  { %v4298_v38 = vpop.eup %4297  ;;  %v698_v39 = vadd.f32 %v5044_v48, %v697_v37  ;;  %3915 = vmatprep.mubr.msk.f32.mxu0 %vm482_vm1, %v4296_v4 }
 0x1c4   :  { %v3876_v41 = vpop.f32.mrf.mxu1  ;;  %3916 = vmatmul.mubr.msk.f32.vlgmr.msra.gmra.mxu0 %vm482_vm1, %v4298_v38 }
 0x1c5   :  { %4311 = vtanh.f32 %v698_v39  ;;  %4014 = vmatpush3.xpose.msk.msra.mxu0 %vm105_vm0, %v1559_v47  ;;  %v713_v43 = vadd.f32 %v3876_v41, %v5044_v48 }
 0x1c6   :  { %v4300_v42 = vpop.eup %4299  ;;  %4313 = vtanh.f32 %v703_v36  ;;  %v707_v44 = vpop.f32.mrf.mxu1  ;;  %4015 = vmatprep.subr.msk.mxu0 %vm105_vm0, %v1558_v40 }
 0x1c7   :  { %v4302_v45 = vpop.eup %4301  ;;  %v708_v46 = vadd.f32 %v5044_v48, %v707_v44  ;;  %3918 = vmatprep.mubr.msk.f32.mxu0 %vm482_vm1, %v4300_v42 }
 0x1c8   :  { %v3879_v50 = vpop.f32.mrf.mxu1  ;;  %3919 = vmatmul.mubr.msk.f32.gmra.mxu0 %vm482_vm1, %v4302_v45 }
 0x1c9   :  { %4315 = vtanh.f32 %v708_v46  ;;  %4016 = vmatpush3.xpose.msk.msra.mxu0 %vm105_vm0, %v1558_v40  ;;  %v723_v51 = vadd.f32 %v3879_v50, %v5044_v48 }
 0x1ca   :  { %v4304_v47 = vpop.eup %4303  ;;  %4317 = vtanh.f32 %v713_v43  ;;  %v717_v52 = vpop.f32.mrf.mxu1  ;;  %4017 = vmatprep.subr.msk.mxu0 %vm105_vm0, %v1557_v49 }
 0x1cb   :  { %v4306_v53 = vpop.eup %4305  ;;  %v718_v54 = vadd.f32 %v5044_v48, %v717_v52  ;;  %3921 = vmatprep.mubr.msk.f32.mxu0 %vm482_vm1, %v4304_v47 }
 0x1cc   :  { %v3882_v56 = vpop.f32.mrf.mxu1  ;;  %3922 = vmatmul.mubr.msk.f32.gmra.mxu0 %vm482_vm1, %v4306_v53 }
 0x1cd   :  { %4319 = vtanh.f32 %v718_v54  ;;  %4018 = vmatpush3.xpose.msk.msra.mxu0 %vm105_vm0, %v1557_v49  ;;  %v733_v58 = vadd.f32 %v3882_v56, %v5044_v48 }
 0x1ce   :  { %v4308_v57 = vpop.eup %4307  ;;  %4321 = vtanh.f32 %v723_v51  ;;  %v727_v59 = vpop.f32.mrf.mxu1  ;;  %4019 = vmatprep.subr.msk.mxu0 %vm105_vm0, %v1556_v55 }
 0x1cf   :  { %v4310_v60 = vpop.eup %4309  ;;  %v728_v61 = vadd.f32 %v5044_v48, %v727_v59  ;;  %3924 = vmatprep.mubr.msk.f32.mxu0 %vm482_vm1, %v4308_v57 }
 0x1d0   :  { %v3885_v62 = vpop.f32.mrf.mxu1  ;;  %3925 = vmatmul.mubr.msk.f32.gmra.mxu0 %vm482_vm1, %v4310_v60 }
 0x1d1   :  { %4323 = vtanh.f32 %v728_v61  ;;  %4020 = vmatpush3.xpose.msk.msra.mxu0 %vm105_vm0, %v1556_v55  ;;  %v743_v0 = vadd.f32 %v3885_v62, %v5044_v48 }
 0x1d2   :  { %v4312_v63 = vpop.eup %4311  ;;  %4325 = vtanh.f32 %v733_v58  ;;  %v737_v1 = vpop.f32.mrf.mxu1 }
 0x1d3   :  { %v4314_v3 = vpop.eup %4313  ;;  %v738_v4 = vadd.f32 %v5044_v48, %v737_v1  ;;  %3927 = vmatprep.mubr.msk.f32.mxu0 %vm482_vm1, %v4312_v63 }
 0x1d4   :  { %v3888_v36 = vpop.f32.mrf.mxu1  ;;  %3928 = vmatmul.mubr.msk.f32.gmra.mxu0 %vm482_vm1, %v4314_v3 }
 0x1d5   :  { %4327 = vtanh.f32 %v738_v4  ;;  %v753_v38 = vadd.f32 %v3888_v36, %v5044_v48 }
 0x1d6   :  { %v4316_v37 = vpop.eup %4315  ;;  %4329 = vtanh.f32 %v743_v0  ;;  %v747_v39 = vpop.f32.mrf.mxu1 }
 0x1d7   :  { %v4318_v40 = vpop.eup %4317  ;;  %v748_v41 = vadd.f32 %v5044_v48, %v747_v39  ;;  %3930 = vmatprep.mubr.msk.f32.mxu0 %vm482_vm1, %v4316_v37 }
 0x1d8   :  { %v3891_v42 = vpop.f32.mrf.mxu1  ;;  %3931 = vmatmul.mubr.msk.f32.gmra.mxu0 %vm482_vm1, %v4318_v40 }
 0x1d9   :  { %4331 = vtanh.f32 %v748_v41  ;;  %v763_v44 = vadd.f32 %v3891_v42, %v5044_v48 }
 0x1da   :  { %v4320_v43 = vpop.eup %4319  ;;  %4333 = vtanh.f32 %v753_v38  ;;  %v757_v45 = vpop.f32.mrf.mxu1 }
 0x1db   :  { %v4322_v46 = vpop.eup %4321  ;;  %v758_v49 = vadd.f32 %v5044_v48, %v757_v45  ;;  %3933 = vmatprep.mubr.msk.f32.mxu0 %vm482_vm1, %v4320_v43 }
 0x1dc   :  { %v3894_v50 = vpop.f32.mrf.mxu1  ;;  %3934 = vmatmul.mubr.msk.f32.gmra.mxu0 %vm482_vm1, %v4322_v46 }
 0x1dd   :  { %4335 = vtanh.f32 %v758_v49  ;;  %v773_v51 = vadd.f32 %v3894_v50, %v5044_v48 }
 0x1de   :  { %v4324_v47 = vpop.eup %4323  ;;  %4337 = vtanh.f32 %v763_v44  ;;  %v767_v52 = vpop.f32.mrf.mxu1 }
 0x1df   :  { %v4326_v53 = vpop.eup %4325  ;;  %v768_v54 = vadd.f32 %v5044_v48, %v767_v52  ;;  %3936 = vmatprep.mubr.msk.f32.mxu0 %vm482_vm1, %v4324_v47 }
 0x1e0   :  { %v3897_v55 = vpop.f32.mrf.mxu1  ;;  %3937 = vmatmul.mubr.msk.f32.gmra.mxu0 %vm482_vm1, %v4326_v53 }
 0x1e1   :  { %4339 = vtanh.f32 %v768_v54  ;;  %v783_v57 = vadd.f32 %v3897_v55, %v5044_v48 }
 0x1e2   :  { %v4328_v56 = vpop.eup %4327  ;;  %4341 = vtanh.f32 %v773_v51  ;;  %v777_v58 = vpop.f32.mrf.mxu1 }
 0x1e3   :  { %v4330_v59 = vpop.eup %4329  ;;  %v778_v60 = vadd.f32 %v5044_v48, %v777_v58  ;;  %3939 = vmatprep.mubr.msk.f32.mxu0 %vm482_vm1, %v4328_v56 }
 0x1e4   :  { %v3900_v61 = vpop.f32.mrf.mxu1  ;;  %3940 = vmatmul.mubr.msk.f32.gmra.mxu0 %vm482_vm1, %v4330_v59 }
 0x1e5   :  { %4343 = vtanh.f32 %v778_v60  ;;  %v793_v63 = vadd.f32 %v3900_v61, %v5044_v48  ;;  %v1836_v61 = vld [vmem:[%s6152_s11] sm:$0xff] }
 0x1e6   :  { %v4332_v62 = vpop.eup %4331  ;;  %4345 = vtanh.f32 %v783_v57  ;;  %v787_v0 = vpop.f32.mrf.mxu1 }
 0x1e7   :  { %v4334_v1 = vpop.eup %4333  ;;  %v788_v3 = vadd.f32 %v5044_v48, %v787_v0  ;;  %3942 = vmatprep.mubr.msk.f32.mxu0 %vm482_vm1, %v4332_v62 }
 0x1e8   :  { %v3903_v4 = vpop.f32.mrf.mxu1  ;;  %3943 = vmatmul.mubr.msk.f32.gmra.mxu0 %vm482_vm1, %v4334_v1 }
 0x1e9   :  { %4347 = vtanh.f32 %v788_v3  ;;  %v803_v37 = vadd.f32 %v3903_v4, %v5044_v48 }
 0x1ea   :  { %v4336_v36 = vpop.eup %4335  ;;  %4349 = vtanh.f32 %v793_v63  ;;  %v797_v38 = vpop.f32.mrf.mxu1 }
 0x1eb   :  { %v4338_v39 = vpop.eup %4337  ;;  %v798_v40 = vadd.f32 %v5044_v48, %v797_v38  ;;  %3945 = vmatprep.mubr.msk.f32.mxu0 %vm482_vm1, %v4336_v36 }
 0x1ec   :  { %v3906_v41 = vpop.f32.mrf.mxu1  ;;  %3946 = vmatmul.mubr.msk.f32.gmra.mxu0 %vm482_vm1, %v4338_v39 }
 0x1ed   :  { %4351 = vtanh.f32 %v798_v40  ;;  %v813_v43 = vadd.f32 %v3906_v41, %v5044_v48 }
 0x1ee   :  { %v4340_v42 = vpop.eup %4339  ;;  %4353 = vtanh.f32 %v803_v37  ;;  %v807_v44 = vpop.f32.mrf.mxu1 }
 0x1ef   :  { %v4342_v45 = vpop.eup %4341  ;;  %v808_v46 = vadd.f32 %v5044_v48, %v807_v44  ;;  %3948 = vmatprep.mubr.msk.f32.mxu0 %vm482_vm1, %v4340_v42 }
 0x1f0   :  { %3949 = vmatmul.mubr.msk.f32.gmra.mxu0 %vm482_vm1, %v4342_v45 }
 0x1f1   :  { %4355 = vtanh.f32 %v808_v46 }
 0x1f2   :  { %v4344_v49 = vpop.eup %4343  ;;  %4357 = vtanh.f32 %v813_v43 }
 0x1f3   :  { %v4346_v50 = vpop.eup %4345  ;;  %3951 = vmatprep.mubr.msk.f32.mxu0 %vm482_vm1, %v4344_v49 }
 0x1f4   :  { %3952 = vmatmul.mubr.msk.f32.gmra.mxu0 %vm482_vm1, %v4346_v50 }
 0x1f6   :  { %v4348_v47 = vpop.eup %4347 }
 0x1f7   :  { %v4350_v51 = vpop.eup %4349  ;;  %3954 = vmatprep.mubr.msk.f32.mxu0 %vm482_vm1, %v4348_v47 }
 0x1f8   :  { %3955 = vmatmul.mubr.msk.f32.gmra.mxu0 %vm482_vm1, %v4350_v51 }
 0x1fa   :  { %v4352_v52 = vpop.eup %4351 }
 0x1fb   :  { %v4354_v48 = vpop.eup %4353  ;;  %3957 = vmatprep.mubr.msk.f32.mxu0 %vm482_vm1, %v4352_v52 }
 0x1fc   :  { %3958 = vmatmul.mubr.msk.f32.gmra.mxu0 %vm482_vm1, %v4354_v48 }
 0x1fe   :  { %v4356_v53 = vpop.eup %4355 }
 0x1ff   :  { %v4358_v54 = vpop.eup %4357  ;;  %3960 = vmatprep.mubr.msk.f32.mxu0 %vm482_vm1, %v4356_v53 }
 0x200   :  { %3961 = vmatmul.mubr.msk.f32.gmra.mxu0 %vm482_vm1, %v4358_v54 }
 0x201   :  { %4021 = vmatprep.mubr.msk.f32.mxu0 %vm105_vm0, %v4694_v2  ;;  %v1839_v2 = vld [vmem:[%s6152_s11 + $0x18] sm:$0xff] }
 0x202   :  { %4069 = vmatprep.subr.msk.mxu1 %vm482_vm1, %v1839_v2 }
 0x204   :  { %4022 = vmatmul.mubr.msk.f32.vlgmr.msra.gmra.mxu0 %vm105_vm0, %v4714_v5  ;;  %v5202_v5 = vld [vmem:[%s6153_s8] ss:$0 sm:$0xff] }
 0x205   :  { %4024 = vmatprep.mubr.msk.f32.mxu0 %vm105_vm0, %v4719_v6 }
 0x208   :  { %4025 = vmatmul.mubr.msk.f32.gmra.mxu0 %vm105_vm0, %v4728_v7 }
 0x209   :  { %4027 = vmatprep.mubr.msk.f32.mxu0 %vm105_vm0, %v4733_v8 }
 0x20c   :  { %4028 = vmatmul.mubr.msk.f32.gmra.mxu0 %vm105_vm0, %v4742_v9 }
 0x20d   :  { %4030 = vmatprep.mubr.msk.f32.mxu0 %vm105_vm0, %v4747_v10 }
 0x210   :  { %4031 = vmatmul.mubr.msk.f32.gmra.mxu0 %vm105_vm0, %v4756_v11 }
 0x211   :  { %4033 = vmatprep.mubr.msk.f32.mxu0 %vm105_vm0, %v4761_v12 }
 0x214   :  { %4034 = vmatmul.mubr.msk.f32.gmra.mxu0 %vm105_vm0, %v4770_v13 }
 0x215   :  { %4036 = vmatprep.mubr.msk.f32.mxu0 %vm105_vm0, %v4775_v14 }
 0x218   :  { %4037 = vmatmul.mubr.msk.f32.gmra.mxu0 %vm105_vm0, %v4784_v15 }
 0x219   :  { %4039 = vmatprep.mubr.msk.f32.mxu0 %vm105_vm0, %v4789_v16 }
 0x21c   :  { %4040 = vmatmul.mubr.msk.f32.gmra.mxu0 %vm105_vm0, %v4798_v17 }
 0x21d   :  { %4042 = vmatprep.mubr.msk.f32.mxu0 %vm105_vm0, %v4803_v18 }
 0x220   :  { %4043 = vmatmul.mubr.msk.f32.gmra.mxu0 %vm105_vm0, %v4812_v19 }
 0x221   :  { %4045 = vmatprep.mubr.msk.f32.mxu0 %vm105_vm0, %v4817_v20 }
 0x224   :  { %4046 = vmatmul.mubr.msk.f32.gmra.mxu0 %vm105_vm0, %v4826_v21 }
 0x225   :  { %4048 = vmatprep.mubr.msk.f32.mxu0 %vm105_vm0, %v4831_v22 }
 0x228   :  { %4049 = vmatmul.mubr.msk.f32.gmra.mxu0 %vm105_vm0, %v4840_v23 }
 0x229   :  { %4051 = vmatprep.mubr.msk.f32.mxu0 %vm105_vm0, %v4845_v24 }
 0x22c   :  { %4052 = vmatmul.mubr.msk.f32.gmra.mxu0 %vm105_vm0, %v4854_v25 }
 0x22d   :  { %4054 = vmatprep.mubr.msk.f32.mxu0 %vm105_vm0, %v4859_v26 }
 0x230   :  { %4055 = vmatmul.mubr.msk.f32.gmra.mxu0 %vm105_vm0, %v4868_v27 }
 0x231   :  { %4057 = vmatprep.mubr.msk.f32.mxu0 %vm105_vm0, %v4873_v28  ;;  %v1838_v28 = vld [vmem:[%s6152_s11 + $0x10] sm:$0xff] }
 0x234   :  { %4058 = vmatmul.mubr.msk.f32.gmra.mxu0 %vm105_vm0, %v4882_v29 }
 0x235   :  { %4060 = vmatprep.mubr.msk.f32.mxu0 %vm105_vm0, %v4887_v30 }
 0x238   :  { %4061 = vmatmul.mubr.msk.f32.gmra.mxu0 %vm105_vm0, %v4896_v31 }
 0x239   :  { %4063 = vmatprep.mubr.msk.f32.mxu0 %vm105_vm0, %v4901_v32 }
 0x23c   :  { %4064 = vmatmul.mubr.msk.f32.gmra.mxu0 %vm105_vm0, %v4910_v33 }
 0x23d   :  { %4066 = vmatprep.mubr.msk.f32.mxu0 %vm105_vm0, %v4915_v34 }
 0x240   :  { %4067 = vmatmul.mubr.msk.f32.gmra.mxu0 %vm105_vm0, %v4924_v35  ;;  %v1837_v35 = vld [vmem:[%s6152_s11 + $0x8] sm:$0xff] }
 0x284   :  { %v3917_v6 = vpop.f32.mrf.mxu0 }
 0x285   :  { %v1039_v7 = vadd.f32 %v3917_v6, %v5202_v5 }
 0x286   :  { %v1033_v8 = vpop.f32.mrf.mxu0 }
 0x287   :  { %v1034_v9 = vadd.f32 %v5202_v5, %v1033_v8 }
 0x288   :  { %v3920_v10 = vpop.f32.mrf.mxu0 }
 0x289   :  { %4359 = vtanh.f32 %v1034_v9  ;;  %v1049_v11 = vadd.f32 %v3920_v10, %v5202_v5 }
 0x28a   :  { %4361 = vtanh.f32 %v1039_v7  ;;  %v1043_v12 = vpop.f32.mrf.mxu0 }
 0x28b   :  { %v1044_v13 = vadd.f32 %v5202_v5, %v1043_v12 }
 0x28c   :  { %v3923_v14 = vpop.f32.mrf.mxu0 }
 0x28d   :  { %4363 = vtanh.f32 %v1044_v13  ;;  %v1059_v15 = vadd.f32 %v3923_v14, %v5202_v5 }
 0x28e   :  { %4365 = vtanh.f32 %v1049_v11  ;;  %v1053_v16 = vpop.f32.mrf.mxu0 }
 0x28f   :  { %v1054_v17 = vadd.f32 %v5202_v5, %v1053_v16 }
 0x290   :  { %v3926_v18 = vpop.f32.mrf.mxu0 }
 0x291   :  { %4367 = vtanh.f32 %v1054_v17  ;;  %v1069_v19 = vadd.f32 %v3926_v18, %v5202_v5 }
 0x292   :  { %4369 = vtanh.f32 %v1059_v15  ;;  %v1063_v20 = vpop.f32.mrf.mxu0 }
 0x293   :  { %v1064_v21 = vadd.f32 %v5202_v5, %v1063_v20 }
 0x294   :  { %v3929_v22 = vpop.f32.mrf.mxu0 }
 0x295   :  { %4371 = vtanh.f32 %v1064_v21  ;;  %v1079_v24 = vadd.f32 %v3929_v22, %v5202_v5 }
 0x296   :  { %v4360_v23 = vpop.eup %4359  ;;  %4373 = vtanh.f32 %v1069_v19  ;;  %v1073_v25 = vpop.f32.mrf.mxu0 }
 0x297   :  { %v4362_v26 = vpop.eup %4361  ;;  %v1074_v27 = vadd.f32 %v5202_v5, %v1073_v25  ;;  %3965 = vmatprep.mubr.msk.f32.mxu1 %vm482_vm1, %v4360_v23 }
 0x298   :  { %v3932_v29 = vpop.f32.mrf.mxu0  ;;  %3966 = vmatmul.mubr.msk.f32.vlgmr.msra.gmra.mxu1 %vm482_vm1, %v4362_v26 }
 0x299   :  { %4375 = vtanh.f32 %v1074_v27  ;;  %4070 = vmatpush3.xpose.msk.msra.mxu1 %vm482_vm1, %v1839_v2  ;;  %v1089_v31 = vadd.f32 %v3932_v29, %v5202_v5 }
 0x29a   :  { %v4364_v30 = vpop.eup %4363  ;;  %4377 = vtanh.f32 %v1079_v24  ;;  %v1083_v32 = vpop.f32.mrf.mxu0  ;;  %4071 = vmatprep.subr.msk.mxu1 %vm482_vm1, %v1838_v28 }
 0x29b   :  { %v4366_v33 = vpop.eup %4365  ;;  %v1084_v34 = vadd.f32 %v5202_v5, %v1083_v32  ;;  %3968 = vmatprep.mubr.msk.f32.mxu1 %vm482_vm1, %v4364_v30 }
 0x29c   :  { %v3935_v55 = vpop.f32.mrf.mxu0  ;;  %3969 = vmatmul.mubr.msk.f32.gmra.mxu1 %vm482_vm1, %v4366_v33 }
 0x29d   :  { %4379 = vtanh.f32 %v1084_v34  ;;  %4072 = vmatpush3.xpose.msk.msra.mxu1 %vm482_vm1, %v1838_v28  ;;  %v1099_v57 = vadd.f32 %v3935_v55, %v5202_v5 }
 0x29e   :  { %v4368_v56 = vpop.eup %4367  ;;  %4381 = vtanh.f32 %v1089_v31  ;;  %v1093_v58 = vpop.f32.mrf.mxu0  ;;  %4073 = vmatprep.subr.msk.mxu1 %vm482_vm1, %v1837_v35 }
 0x29f   :  { %v4370_v59 = vpop.eup %4369  ;;  %v1094_v60 = vadd.f32 %v5202_v5, %v1093_v58  ;;  %3971 = vmatprep.mubr.msk.f32.mxu1 %vm482_vm1, %v4368_v56 }
 0x2a0   :  { %v3938_v62 = vpop.f32.mrf.mxu0  ;;  %3972 = vmatmul.mubr.msk.f32.gmra.mxu1 %vm482_vm1, %v4370_v59 }
 0x2a1   :  { %4383 = vtanh.f32 %v1094_v60  ;;  %4074 = vmatpush3.xpose.msk.msra.mxu1 %vm482_vm1, %v1837_v35  ;;  %v1109_v0 = vadd.f32 %v3938_v62, %v5202_v5 }
 0x2a2   :  { %v4372_v63 = vpop.eup %4371  ;;  %4385 = vtanh.f32 %v1099_v57  ;;  %v1103_v1 = vpop.f32.mrf.mxu0  ;;  %4075 = vmatprep.subr.msk.mxu1 %vm482_vm1, %v1836_v61 }
 0x2a3   :  { %v4374_v3 = vpop.eup %4373  ;;  %v1104_v4 = vadd.f32 %v5202_v5, %v1103_v1  ;;  %3974 = vmatprep.mubr.msk.f32.mxu1 %vm482_vm1, %v4372_v63 }
 0x2a4   :  { %v3941_v36 = vpop.f32.mrf.mxu0  ;;  %3975 = vmatmul.mubr.msk.f32.gmra.mxu1 %vm482_vm1, %v4374_v3 }
 0x2a5   :  { %4387 = vtanh.f32 %v1104_v4  ;;  %4076 = vmatpush3.xpose.msk.msra.mxu1 %vm482_vm1, %v1836_v61  ;;  %v1119_v38 = vadd.f32 %v3941_v36, %v5202_v5 }
 0x2a6   :  { %v4376_v37 = vpop.eup %4375  ;;  %4389 = vtanh.f32 %v1109_v0  ;;  %v1113_v39 = vpop.f32.mrf.mxu0 }
 0x2a7   :  { %v4378_v40 = vpop.eup %4377  ;;  %v1114_v41 = vadd.f32 %v5202_v5, %v1113_v39  ;;  %3977 = vmatprep.mubr.msk.f32.mxu1 %vm482_vm1, %v4376_v37 }
 0x2a8   :  { %v3944_v42 = vpop.f32.mrf.mxu0  ;;  %3978 = vmatmul.mubr.msk.f32.gmra.mxu1 %vm482_vm1, %v4378_v40 }
 0x2a9   :  { %4391 = vtanh.f32 %v1114_v41  ;;  %v1129_v44 = vadd.f32 %v3944_v42, %v5202_v5 }
 0x2aa   :  { %v4380_v43 = vpop.eup %4379  ;;  %4393 = vtanh.f32 %v1119_v38  ;;  %v1123_v45 = vpop.f32.mrf.mxu0 }
 0x2ab   :  { %v4382_v46 = vpop.eup %4381  ;;  %v1124_v49 = vadd.f32 %v5202_v5, %v1123_v45  ;;  %3980 = vmatprep.mubr.msk.f32.mxu1 %vm482_vm1, %v4380_v43 }
 0x2ac   :  { %v3947_v50 = vpop.f32.mrf.mxu0  ;;  %3981 = vmatmul.mubr.msk.f32.gmra.mxu1 %vm482_vm1, %v4382_v46 }
 0x2ad   :  { %4395 = vtanh.f32 %v1124_v49  ;;  %v1139_v51 = vadd.f32 %v3947_v50, %v5202_v5 }
 0x2ae   :  { %v4384_v47 = vpop.eup %4383  ;;  %4397 = vtanh.f32 %v1129_v44  ;;  %v1133_v52 = vpop.f32.mrf.mxu0 }
 0x2af   :  { %v4386_v48 = vpop.eup %4385  ;;  %v1134_v53 = vadd.f32 %v5202_v5, %v1133_v52  ;;  %3983 = vmatprep.mubr.msk.f32.mxu1 %vm482_vm1, %v4384_v47 }
 0x2b0   :  { %v3950_v54 = vpop.f32.mrf.mxu0  ;;  %3984 = vmatmul.mubr.msk.f32.gmra.mxu1 %vm482_vm1, %v4386_v48 }
 0x2b1   :  { %4399 = vtanh.f32 %v1134_v53  ;;  %v1149_v6 = vadd.f32 %v3950_v54, %v5202_v5 }
 0x2b2   :  { %v4388_v2 = vpop.eup %4387  ;;  %4401 = vtanh.f32 %v1139_v51  ;;  %v1143_v7 = vpop.f32.mrf.mxu0 }
 0x2b3   :  { %v4390_v8 = vpop.eup %4389  ;;  %v1144_v9 = vadd.f32 %v5202_v5, %v1143_v7  ;;  %3986 = vmatprep.mubr.msk.f32.mxu1 %vm482_vm1, %v4388_v2 }
 0x2b4   :  { %v3953_v10 = vpop.f32.mrf.mxu0  ;;  %3987 = vmatmul.mubr.msk.f32.gmra.mxu1 %vm482_vm1, %v4390_v8 }
 0x2b5   :  { %4403 = vtanh.f32 %v1144_v9  ;;  %v1159_v12 = vadd.f32 %v3953_v10, %v5202_v5 }
 0x2b6   :  { %v4392_v11 = vpop.eup %4391  ;;  %4405 = vtanh.f32 %v1149_v6  ;;  %v1153_v13 = vpop.f32.mrf.mxu0 }
 0x2b7   :  { %v4394_v14 = vpop.eup %4393  ;;  %v1154_v15 = vadd.f32 %v5202_v5, %v1153_v13  ;;  %3989 = vmatprep.mubr.msk.f32.mxu1 %vm482_vm1, %v4392_v11 }
 0x2b8   :  { %v3956_v16 = vpop.f32.mrf.mxu0  ;;  %3990 = vmatmul.mubr.msk.f32.gmra.mxu1 %vm482_vm1, %v4394_v14 }
 0x2b9   :  { %4407 = vtanh.f32 %v1154_v15  ;;  %v1169_v18 = vadd.f32 %v3956_v16, %v5202_v5 }
 0x2ba   :  { %v4396_v17 = vpop.eup %4395  ;;  %4409 = vtanh.f32 %v1159_v12  ;;  %v1163_v19 = vpop.f32.mrf.mxu0 }
 0x2bb   :  { %v4398_v20 = vpop.eup %4397  ;;  %v1164_v21 = vadd.f32 %v5202_v5, %v1163_v19  ;;  %3992 = vmatprep.mubr.msk.f32.mxu1 %vm482_vm1, %v4396_v17 }
 0x2bc   :  { %v3959_v22 = vpop.f32.mrf.mxu0  ;;  %3993 = vmatmul.mubr.msk.f32.gmra.mxu1 %vm482_vm1, %v4398_v20 }
 0x2bd   :  { %4411 = vtanh.f32 %v1164_v21  ;;  %v1179_v24 = vadd.f32 %v3959_v22, %v5202_v5 }
 0x2be   :  { %v4400_v23 = vpop.eup %4399  ;;  %4413 = vtanh.f32 %v1169_v18  ;;  %v1173_v25 = vpop.f32.mrf.mxu0 }
 0x2bf   :  { %v4402_v26 = vpop.eup %4401  ;;  %v1174_v27 = vadd.f32 %v5202_v5, %v1173_v25  ;;  %3995 = vmatprep.mubr.msk.f32.mxu1 %vm482_vm1, %v4400_v23 }
 0x2c0   :  { %v3962_v28 = vpop.f32.mrf.mxu0  ;;  %3996 = vmatmul.mubr.msk.f32.gmra.mxu1 %vm482_vm1, %v4402_v26 }
 0x2c1   :  { %4415 = vtanh.f32 %v1174_v27  ;;  %v1189_v30 = vadd.f32 %v3962_v28, %v5202_v5 }
 0x2c2   :  { %v4404_v29 = vpop.eup %4403  ;;  %4417 = vtanh.f32 %v1179_v24  ;;  %v1183_v31 = vpop.f32.mrf.mxu0 }
 0x2c3   :  { %v4406_v32 = vpop.eup %4405  ;;  %v1184_v33 = vadd.f32 %v5202_v5, %v1183_v31  ;;  %3998 = vmatprep.mubr.msk.f32.mxu1 %vm482_vm1, %v4404_v29  ;;  %v5281_v5 = vld [vmem:[%s6154_s14] ss:$0 sm:$0xff] }
 0x2c4   :  { %3999 = vmatmul.mubr.msk.f32.gmra.mxu1 %vm482_vm1, %v4406_v32  ;;  %v4023_v34 = vpop.f32.mrf.mxu0 }
 0x2c5   :  { %4419 = vtanh.f32 %v1184_v33  ;;  %v1651_v38 = vadd.f32 %v4023_v34, %v5281_v5 }
 0x2c6   :  { %v4408_v35 = vpop.eup %4407  ;;  %4421 = vtanh.f32 %v1189_v30  ;;  %v1645_v55 = vpop.f32.mrf.mxu0 }
 0x2c7   :  { %v4410_v56 = vpop.eup %4409  ;;  %4001 = vmatprep.mubr.msk.f32.mxu1 %vm482_vm1, %v4408_v35  ;;  %v1646_v62 = vadd.f32 %v5281_v5, %v1645_v55  ;;  %v1805_v44 = vmax.f32 %v1651_v38, 0.0 }
 0x2c8   :  { %4002 = vmatmul.mubr.msk.f32.gmra.mxu1 %vm482_vm1, %v4410_v56  ;;  %v4026_v57 = vpop.f32.mrf.mxu0 }
 0x2c9   :  { %v1804_v4 = vmax.f32 %v1646_v62, 0.0  ;;  %v1661_v45 = vadd.f32 %v4026_v57, %v5281_v5 }
 0x2ca   :  { %v4412_v58 = vpop.eup %4411  ;;  %v1655_v59 = vpop.f32.mrf.mxu0 }
 0x2cb   :  { %v4414_v60 = vpop.eup %4413  ;;  %4004 = vmatprep.mubr.msk.f32.mxu1 %vm482_vm1, %v4412_v58  ;;  %v1656_v36 = vadd.f32 %v5281_v5, %v1655_v59  ;;  %v1807_v51 = vmax.f32 %v1661_v45, 0.0  ;;  %v2215_v59 = vld [vmem:[%s6155_s12 + $0x18] sm:$0xff] }
 0x2cc   :  { %4005 = vmatmul.mubr.msk.f32.gmra.mxu1 %vm482_vm1, %v4414_v60  ;;  %v4029_v61 = vpop.f32.mrf.mxu0  ;;  %4125 = vmatprep.subr.msk.mxu0 %vm482_vm1, %v2215_v59 }
 0x2cd   :  { %v1806_v42 = vmax.f32 %v1656_v36, 0.0  ;;  %v1671_v52 = vadd.f32 %v4029_v61, %v5281_v5  ;;  %4126 = vmatpush3.xpose.msk.msra.mxu0 %vm482_vm1, %v2215_v59 }
 0x2ce   :  { %v4416_v63 = vpop.eup %4415  ;;  %v1665_v0 = vpop.f32.mrf.mxu0 }
 0x2cf   :  { %v4418_v1 = vpop.eup %4417  ;;  %4007 = vmatprep.mubr.msk.f32.mxu1 %vm482_vm1, %v4416_v63  ;;  %v1666_v43 = vadd.f32 %v5281_v5, %v1665_v0  ;;  %v1809_v6 = vmax.f32 %v1671_v52, 0.0 }
 0x2d0   :  { %4008 = vmatmul.mubr.msk.f32.gmra.mxu1 %vm482_vm1, %v4418_v1  ;;  %v4032_v3 = vpop.f32.mrf.mxu0 }
 0x2d1   :  { %v1808_v50 = vmax.f32 %v1666_v43, 0.0  ;;  %v1681_v7 = vadd.f32 %v4032_v3, %v5281_v5 }
 0x2d2   :  { %v4420_v37 = vpop.eup %4419  ;;  %v1675_v39 = vpop.f32.mrf.mxu0 }
 0x2d3   :  { %v4422_v40 = vpop.eup %4421  ;;  %4010 = vmatprep.mubr.msk.f32.mxu1 %vm482_vm1, %v4420_v37  ;;  %v1676_v47 = vadd.f32 %v5281_v5, %v1675_v39  ;;  %v1811_v12 = vmax.f32 %v1681_v7, 0.0 }
 0x2d4   :  { %4011 = vmatmul.mubr.msk.f32.gmra.mxu1 %vm482_vm1, %v4422_v40  ;;  %v4035_v41 = vpop.f32.mrf.mxu0 }
 0x2d5   :  { %4077 = vmatprep.mubr.msk.f32.mxu1 %vm482_vm1, %v1804_v4  ;;  %v1810_v54 = vmax.f32 %v1676_v47, 0.0  ;;  %v1691_v13 = vadd.f32 %v4035_v41, %v5281_v5 }
 0x2d6   :  { %v1685_v46 = vpop.f32.mrf.mxu0 }
 0x2d7   :  { %v1686_v2 = vadd.f32 %v5281_v5, %v1685_v46  ;;  %v1813_v18 = vmax.f32 %v1691_v13, 0.0 }
 0x2d8   :  { %4078 = vmatmul.mubr.msk.f32.vlgmr.msra.gmra.mxu1 %vm482_vm1, %v1805_v44  ;;  %v4038_v49 = vpop.f32.mrf.mxu0 }
 0x2d9   :  { %4080 = vmatprep.mubr.msk.f32.mxu1 %vm482_vm1, %v1806_v42  ;;  %v1812_v10 = vmax.f32 %v1686_v2, 0.0  ;;  %v1701_v19 = vadd.f32 %v4038_v49, %v5281_v5 }
 0x2da   :  { %v1695_v48 = vpop.f32.mrf.mxu0 }
 0x2db   :  { %v1696_v11 = vadd.f32 %v5281_v5, %v1695_v48  ;;  %v1815_v24 = vmax.f32 %v1701_v19, 0.0 }
 0x2dc   :  { %4081 = vmatmul.mubr.msk.f32.gmra.mxu1 %vm482_vm1, %v1807_v51  ;;  %v4041_v53 = vpop.f32.mrf.mxu0  ;;  %v2214_v51 = vld [vmem:[%s6155_s12 + $0x10] sm:$0xff] }
 0x2dd   :  { %4083 = vmatprep.mubr.msk.f32.mxu1 %vm482_vm1, %v1808_v50  ;;  %v1814_v16 = vmax.f32 %v1696_v11, 0.0  ;;  %v1711_v25 = vadd.f32 %v4041_v53, %v5281_v5  ;;  %4127 = vmatprep.subr.msk.mxu0 %vm482_vm1, %v2214_v51 }
 0x2de   :  { %v1705_v8 = vpop.f32.mrf.mxu0  ;;  %4128 = vmatpush3.xpose.msk.msra.mxu0 %vm482_vm1, %v2214_v51 }
 0x2df   :  { %v1706_v17 = vadd.f32 %v5281_v5, %v1705_v8  ;;  %v1817_v30 = vmax.f32 %v1711_v25, 0.0 }
 0x2e0   :  { %4084 = vmatmul.mubr.msk.f32.gmra.mxu1 %vm482_vm1, %v1809_v6  ;;  %v4044_v9 = vpop.f32.mrf.mxu0 }
 0x2e1   :  { %4086 = vmatprep.mubr.msk.f32.mxu1 %vm482_vm1, %v1810_v54  ;;  %v1816_v22 = vmax.f32 %v1706_v17, 0.0  ;;  %v1721_v31 = vadd.f32 %v4044_v9, %v5281_v5 }
 0x2e2   :  { %v1715_v14 = vpop.f32.mrf.mxu0 }
 0x2e3   :  { %v1716_v23 = vadd.f32 %v5281_v5, %v1715_v14  ;;  %v1819_v55 = vmax.f32 %v1721_v31, 0.0  ;;  %v2213_v14 = vld [vmem:[%s6155_s12 + $0x8] sm:$0xff]  ;;  %v5393_v31 = vld [vmem:[%s6158_s1] ss:$0 sm:$0xff] }
 0x2e4   :  { %4087 = vmatmul.mubr.msk.f32.gmra.mxu1 %vm482_vm1, %v1811_v12  ;;  %v4047_v15 = vpop.f32.mrf.mxu0  ;;  %4129 = vmatprep.subr.msk.mxu0 %vm482_vm1, %v2213_v14 }
 0x2e5   :  { %4089 = vmatprep.mubr.msk.f32.mxu1 %vm482_vm1, %v1812_v10  ;;  %v1818_v28 = vmax.f32 %v1716_v23, 0.0  ;;  %v1731_v56 = vadd.f32 %v4047_v15, %v5281_v5  ;;  %4130 = vmatpush3.xpose.msk.msra.mxu0 %vm482_vm1, %v2213_v14  ;;  %v2212_v15 = vld [vmem:[%s6155_s12] sm:$0xff] }
 0x2e6   :  { %v1725_v20 = vpop.f32.mrf.mxu0  ;;  %4131 = vmatprep.subr.msk.mxu0 %vm482_vm1, %v2212_v15  ;;  %v2588_v23 = vld [vmem:[%s6157_s13] sm:$0xff] }
 0x2e7   :  { %v1726_v29 = vadd.f32 %v5281_v5, %v1725_v20  ;;  %v1821_v62 = vmax.f32 %v1731_v56, 0.0  ;;  %4181 = vmatprep.subr.msk.mxu1 %vm482_vm1, %v2588_v23 }
 0x2e8   :  { %4090 = vmatmul.mubr.msk.f32.gmra.mxu1 %vm482_vm1, %v1813_v18  ;;  %v4050_v21 = vpop.f32.mrf.mxu0 }
 0x2e9   :  { %4092 = vmatprep.mubr.msk.f32.mxu1 %vm482_vm1, %v1814_v16  ;;  %v1820_v34 = vmax.f32 %v1726_v29, 0.0  ;;  %v1741_v63 = vadd.f32 %v4050_v21, %v5281_v5  ;;  %4132 = vmatpush3.xpose.msk.msra.mxu0 %vm482_vm1, %v2212_v15 }
 0x2ea   :  { %v1735_v26 = vpop.f32.mrf.mxu0  ;;  %4182 = vmatpush3.xpose.msk.msra.mxu1 %vm482_vm1, %v2588_v23 }
 0x2eb   :  { %v1736_v35 = vadd.f32 %v5281_v5, %v1735_v26  ;;  %v1823_v36 = vmax.f32 %v1741_v63, 0.0 }
 0x2ec   :  { %4093 = vmatmul.mubr.msk.f32.gmra.mxu1 %vm482_vm1, %v1815_v24  ;;  %v4053_v27 = vpop.f32.mrf.mxu0 }
 0x2ed   :  { %4095 = vmatprep.mubr.msk.f32.mxu1 %vm482_vm1, %v1816_v22  ;;  %v1822_v60 = vmax.f32 %v1736_v35, 0.0  ;;  %v1751_v37 = vadd.f32 %v4053_v27, %v5281_v5 }
 0x2ee   :  { %v1745_v32 = vpop.f32.mrf.mxu0 }
 0x2ef   :  { %v1746_v61 = vadd.f32 %v5281_v5, %v1745_v32  ;;  %v1825_v42 = vmax.f32 %v1751_v37, 0.0 }
 0x2f0   :  { %4096 = vmatmul.mubr.msk.f32.gmra.mxu1 %vm482_vm1, %v1817_v30  ;;  %v4056_v33 = vpop.f32.mrf.mxu0 }
 0x2f1   :  { %4098 = vmatprep.mubr.msk.f32.mxu1 %vm482_vm1, %v1818_v28  ;;  %v1824_v3 = vmax.f32 %v1746_v61, 0.0  ;;  %v1761_v43 = vadd.f32 %v4056_v33, %v5281_v5 }
 0x2f2   :  { %v1755_v57 = vpop.f32.mrf.mxu0 }
 0x2f3   :  { %v1756_v4 = vadd.f32 %v5281_v5, %v1755_v57  ;;  %v1827_v49 = vmax.f32 %v1761_v43, 0.0 }
 0x2f4   :  { %4099 = vmatmul.mubr.msk.f32.gmra.mxu1 %vm482_vm1, %v1819_v55  ;;  %v4059_v58 = vpop.f32.mrf.mxu0 }
 0x2f5   :  { %4101 = vmatprep.mubr.msk.f32.mxu1 %vm482_vm1, %v1820_v34  ;;  %v1826_v40 = vmax.f32 %v1756_v4, 0.0  ;;  %v1771_v50 = vadd.f32 %v4059_v58, %v5281_v5 }
 0x2f6   :  { %v1765_v0 = vpop.f32.mrf.mxu0 }
 0x2f7   :  { %v1766_v41 = vadd.f32 %v5281_v5, %v1765_v0  ;;  %v1829_v53 = vmax.f32 %v1771_v50, 0.0 }
 0x2f8   :  { %4102 = vmatmul.mubr.msk.f32.gmra.mxu1 %vm482_vm1, %v1821_v62  ;;  %v4062_v1 = vpop.f32.mrf.mxu0 }
 0x2f9   :  { %4104 = vmatprep.mubr.msk.f32.mxu1 %vm482_vm1, %v1822_v60  ;;  %v1828_v45 = vmax.f32 %v1766_v41, 0.0  ;;  %v1781_v54 = vadd.f32 %v4062_v1, %v5281_v5 }
 0x2fa   :  { %v1775_v38 = vpop.f32.mrf.mxu0 }
 0x2fb   :  { %v1776_v46 = vadd.f32 %v5281_v5, %v1775_v38  ;;  %v1831_v8 = vmax.f32 %v1781_v54, 0.0 }
 0x2fc   :  { %4105 = vmatmul.mubr.msk.f32.gmra.mxu1 %vm482_vm1, %v1823_v36  ;;  %v4065_v39 = vpop.f32.mrf.mxu0 }
 0x2fd   :  { %4107 = vmatprep.mubr.msk.f32.mxu1 %vm482_vm1, %v1824_v3  ;;  %v1830_v52 = vmax.f32 %v1776_v46, 0.0  ;;  %v1791_v9 = vadd.f32 %v4065_v39, %v5281_v5 }
 0x2fe   :  { %v1785_v44 = vpop.f32.mrf.mxu0 }
 0x2ff   :  { %v1786_v48 = vadd.f32 %v5281_v5, %v1785_v44  ;;  %v1833_v11 = vmax.f32 %v1791_v9, 0.0 }
 0x300   :  { %4108 = vmatmul.mubr.msk.f32.gmra.mxu1 %vm482_vm1, %v1825_v42  ;;  %v4068_v47 = vpop.f32.mrf.mxu0 }
 0x301   :  { %4110 = vmatprep.mubr.msk.f32.mxu1 %vm482_vm1, %v1826_v40  ;;  %v1832_v6 = vmax.f32 %v1786_v48, 0.0  ;;  %v1801_v12 = vadd.f32 %v4068_v47, %v5281_v5 }
 0x302   :  { %v1795_v2 = vpop.f32.mrf.mxu0 }
 0x303   :  { %v1796_v7 = vadd.f32 %v5281_v5, %v1795_v2  ;;  %v1835_v13 = vmax.f32 %v1801_v12, 0.0  ;;  %v5376_v5 = vld [vmem:[%s6156_s9] ss:$0 sm:$0xff] }
 0x304   :  { %4111 = vmatmul.mubr.msk.f32.gmra.mxu1 %vm482_vm1, %v1827_v49 }
 0x305   :  { %4113 = vmatprep.mubr.msk.f32.mxu1 %vm482_vm1, %v1828_v45  ;;  %v1834_v10 = vmax.f32 %v1796_v7, 0.0 }
 0x308   :  { %4114 = vmatmul.mubr.msk.f32.gmra.mxu1 %vm482_vm1, %v1829_v53 }
 0x309   :  { %4116 = vmatprep.mubr.msk.f32.mxu1 %vm482_vm1, %v1830_v52 }
 0x30c   :  { %4117 = vmatmul.mubr.msk.f32.gmra.mxu1 %vm482_vm1, %v1831_v8 }
 0x30d   :  { %4119 = vmatprep.mubr.msk.f32.mxu1 %vm482_vm1, %v1832_v6 }
 0x310   :  { %4120 = vmatmul.mubr.msk.f32.gmra.mxu1 %vm482_vm1, %v1833_v11 }
 0x311   :  { %4122 = vmatprep.mubr.msk.f32.mxu1 %vm482_vm1, %v1834_v10 }
 0x314   :  { %4123 = vmatmul.mubr.msk.f32.gmra.mxu1 %vm482_vm1, %v1835_v13 }
 0x358   :  { %v3967_v16 = vpop.f32.mrf.mxu1 }
 0x359   :  { %v1403_v17 = vadd.f32 %v3967_v16, %v5376_v5 }
 0x35a   :  { %v1397_v18 = vpop.f32.mrf.mxu1 }
 0x35b   :  { %4423 = vtanh.f32 %v1403_v17  ;;  %v1398_v19 = vadd.f32 %v5376_v5, %v1397_v18 }
 0x35c   :  { %v3970_v20 = vpop.f32.mrf.mxu1 }
 0x35d   :  { %4425 = vtanh.f32 %v1398_v19  ;;  %v1413_v21 = vadd.f32 %v3970_v20, %v5376_v5 }
 0x35e   :  { %v1407_v22 = vpop.f32.mrf.mxu1 }
 0x35f   :  { %4427 = vtanh.f32 %v1413_v21  ;;  %v1408_v24 = vadd.f32 %v5376_v5, %v1407_v22 }
 0x360   :  { %v3973_v25 = vpop.f32.mrf.mxu1 }
 0x361   :  { %4429 = vtanh.f32 %v1408_v24  ;;  %v1423_v26 = vadd.f32 %v3973_v25, %v5376_v5 }
 0x362   :  { %v1417_v27 = vpop.f32.mrf.mxu1 }
 0x363   :  { %4431 = vtanh.f32 %v1423_v26  ;;  %v1418_v28 = vadd.f32 %v5376_v5, %v1417_v27 }
 0x364   :  { %v3976_v29 = vpop.f32.mrf.mxu1 }
 0x365   :  { %4433 = vtanh.f32 %v1418_v28  ;;  %v1433_v30 = vadd.f32 %v3976_v29, %v5376_v5 }
 0x366   :  { %v1427_v32 = vpop.f32.mrf.mxu1 }
 0x367   :  { %4435 = vtanh.f32 %v1433_v30  ;;  %v1428_v33 = vadd.f32 %v5376_v5, %v1427_v32 }
 0x368   :  { %v4424_v34 = vpop.eup %4423  ;;  %v3979_v35 = vpop.f32.mrf.mxu1 }
 0x369   :  { %v5397_v55 = vmul.f32 %v4424_v34, %v5393_v31  ;;  %4437 = vtanh.f32 %v1428_v33  ;;  %v1443_v56 = vadd.f32 %v3979_v35, %v5376_v5 }
 0x36a   :  { %v4426_v57 = vpop.eup %4425  ;;  %v1437_v58 = vpop.f32.mrf.mxu1 }
 0x36b   :  { %3183 = vst.msk [vmem:[%s6159_s19 + $0x8] sm:$0xff] %vm105_vm0, %v5397_v55  ;;  %v5406_v59 = vmul.f32 %v4426_v57, %v5393_v31  ;;  %4439 = vtanh.f32 %v1443_v56  ;;  %v1438_v60 = vadd.f32 %v5376_v5, %v1437_v58 }
 0x36c   :  { %v4428_v61 = vpop.eup %4427  ;;  %v3982_v62 = vpop.f32.mrf.mxu1 }
 0x36d   :  { %3182 = vst.msk [vmem:[%s6159_s19] sm:$0xff] %vm105_vm0, %v5406_v59  ;;  %v5415_v63 = vmul.f32 %v4428_v61, %v5393_v31  ;;  %v1453_v0 = vadd.f32 %v3982_v62, %v5376_v5  ;;  %4441 = vtanh.f32 %v1438_v60 }
 0x36e   :  { %v4430_v1 = vpop.eup %4429  ;;  %v1447_v3 = vpop.f32.mrf.mxu1 }
 0x36f   :  { %3185 = vst.msk [vmem:[%s6159_s19 + $0x18] sm:$0xff] %vm105_vm0, %v5415_v63  ;;  %v5424_v4 = vmul.f32 %v4430_v1, %v5393_v31  ;;  %v1448_v36 = vadd.f32 %v5376_v5, %v1447_v3  ;;  %4443 = vtanh.f32 %v1453_v0 }
 0x370   :  { %v4432_v37 = vpop.eup %4431  ;;  %v3985_v38 = vpop.f32.mrf.mxu1 }
 0x371   :  { %3184 = vst.msk [vmem:[%s6159_s19 + $0x10] sm:$0xff] %vm105_vm0, %v5424_v4  ;;  %v5433_v39 = vmul.f32 %v4432_v37, %v5393_v31  ;;  %v1463_v40 = vadd.f32 %v3985_v38, %v5376_v5  ;;  %4445 = vtanh.f32 %v1448_v36 }
 0x372   :  { %v4434_v41 = vpop.eup %4433  ;;  %v1457_v42 = vpop.f32.mrf.mxu1 }
 0x373   :  { %3187 = vst.msk [vmem:[%s6159_s19 + $0x28] sm:$0xff] %vm105_vm0, %v5433_v39  ;;  %v5442_v43 = vmul.f32 %v4434_v41, %v5393_v31  ;;  %v1458_v44 = vadd.f32 %v5376_v5, %v1457_v42  ;;  %4447 = vtanh.f32 %v1463_v40 }
 0x374   :  { %v4436_v45 = vpop.eup %4435  ;;  %v3988_v46 = vpop.f32.mrf.mxu1 }
 0x375   :  { %3186 = vst.msk [vmem:[%s6159_s19 + $0x20] sm:$0xff] %vm105_vm0, %v5442_v43  ;;  %v5451_v49 = vmul.f32 %v4436_v45, %v5393_v31  ;;  %v1473_v50 = vadd.f32 %v3988_v46, %v5376_v5  ;;  %4449 = vtanh.f32 %v1458_v44 }
 0x376   :  { %v4438_v47 = vpop.eup %4437  ;;  %v1467_v51 = vpop.f32.mrf.mxu1 }
 0x377   :  { %3189 = vst.msk [vmem:[%s6159_s19 + $0x38] sm:$0xff] %vm105_vm0, %v5451_v49  ;;  %v5460_v52 = vmul.f32 %v4438_v47, %v5393_v31  ;;  %v1468_v48 = vadd.f32 %v5376_v5, %v1467_v51  ;;  %4451 = vtanh.f32 %v1473_v50 }
 0x378   :  { %v4440_v53 = vpop.eup %4439  ;;  %v3991_v54 = vpop.f32.mrf.mxu1 }
 0x379   :  { %3188 = vst.msk [vmem:[%s6159_s19 + $0x30] sm:$0xff] %vm105_vm0, %v5460_v52  ;;  %v5469_v2 = vmul.f32 %v4440_v53, %v5393_v31  ;;  %v1483_v6 = vadd.f32 %v3991_v54, %v5376_v5  ;;  %4453 = vtanh.f32 %v1468_v48 }
 0x37a   :  { %v1477_v7 = vpop.f32.mrf.mxu1  ;;  %v4442_v8 = vpop.eup %4441 }
 0x37b   :  { %3191 = vst.msk [vmem:[%s6159_s19 + $0x48] sm:$0xff] %vm105_vm0, %v5469_v2  ;;  %v1478_v9 = vadd.f32 %v5376_v5, %v1477_v7  ;;  %v5479_v10 = vmul.f32 %v4442_v8, %v5393_v31  ;;  %4455 = vtanh.f32 %v1483_v6 }
 0x37c   :  { %v3994_v11 = vpop.f32.mrf.mxu1  ;;  %v4444_v12 = vpop.eup %4443 }
 0x37d   :  { %v1493_v13 = vadd.f32 %v3994_v11, %v5376_v5  ;;  %3190 = vst.msk [vmem:[%s6159_s19 + $0x40] sm:$0xff] %vm105_vm0, %v5479_v10  ;;  %v5488_v14 = vmul.f32 %v4444_v12, %v5393_v31  ;;  %4457 = vtanh.f32 %v1478_v9 }
 0x37e   :  { %v1487_v15 = vpop.f32.mrf.mxu1  ;;  %v4446_v16 = vpop.eup %4445 }
 0x37f   :  { %4459 = vtanh.f32 %v1493_v13  ;;  %v1488_v17 = vadd.f32 %v5376_v5, %v1487_v15  ;;  %3193 = vst.msk [vmem:[%s6159_s19 + $0x58] sm:$0xff] %vm105_vm0, %v5488_v14  ;;  %v5497_v18 = vmul.f32 %v4446_v16, %v5393_v31 }
 0x380   :  { %v3997_v19 = vpop.f32.mrf.mxu1  ;;  %v4448_v20 = vpop.eup %4447 }
 0x381   :  { %4461 = vtanh.f32 %v1488_v17  ;;  %v1503_v21 = vadd.f32 %v3997_v19, %v5376_v5  ;;  %3192 = vst.msk [vmem:[%s6159_s19 + $0x50] sm:$0xff] %vm105_vm0, %v5497_v18  ;;  %v5506_v22 = vmul.f32 %v4448_v20, %v5393_v31  ;;  %v5610_v19 = vld [vmem:[%s6160_s15] ss:$0 sm:$0xff] }
 0x382   :  { %v1497_v23 = vpop.f32.mrf.mxu1  ;;  %v4450_v24 = vpop.eup %4449 }
 0x383   :  { %4463 = vtanh.f32 %v1503_v21  ;;  %v1498_v25 = vadd.f32 %v5376_v5, %v1497_v23  ;;  %3195 = vst.msk [vmem:[%s6159_s19 + $0x68] sm:$0xff] %vm105_vm0, %v5506_v22  ;;  %v5515_v26 = vmul.f32 %v4450_v24, %v5393_v31 }
 0x384   :  { %v4000_v27 = vpop.f32.mrf.mxu1  ;;  %v4452_v28 = vpop.eup %4451 }
 0x385   :  { %4465 = vtanh.f32 %v1498_v25  ;;  %v1513_v29 = vadd.f32 %v4000_v27, %v5376_v5  ;;  %3194 = vst.msk [vmem:[%s6159_s19 + $0x60] sm:$0xff] %vm105_vm0, %v5515_v26  ;;  %v5524_v30 = vmul.f32 %v4452_v28, %v5393_v31 }
 0x386   :  { %v1507_v32 = vpop.f32.mrf.mxu1  ;;  %v4454_v33 = vpop.eup %4453 }
 0x387   :  { %4467 = vtanh.f32 %v1513_v29  ;;  %v1508_v34 = vadd.f32 %v5376_v5, %v1507_v32  ;;  %3197 = vst.msk [vmem:[%s6159_s19 + $0x78] sm:$0xff] %vm105_vm0, %v5524_v30  ;;  %v5533_v35 = vmul.f32 %v4454_v33, %v5393_v31 }
 0x388   :  { %v4003_v56 = vpop.f32.mrf.mxu1  ;;  %v4456_v57 = vpop.eup %4455 }
 0x389   :  { %4469 = vtanh.f32 %v1508_v34  ;;  %v1523_v58 = vadd.f32 %v4003_v56, %v5376_v5  ;;  %3196 = vst.msk [vmem:[%s6159_s19 + $0x70] sm:$0xff] %vm105_vm0, %v5533_v35  ;;  %v5542_v60 = vmul.f32 %v4456_v57, %v5393_v31 }
 0x38a   :  { %v1517_v61 = vpop.f32.mrf.mxu1  ;;  %v4458_v62 = vpop.eup %4457 }
 0x38b   :  { %4471 = vtanh.f32 %v1523_v58  ;;  %v1518_v0 = vadd.f32 %v5376_v5, %v1517_v61  ;;  %3199 = vst.msk [vmem:[%s6159_s19 + $0x88] sm:$0xff] %vm105_vm0, %v5542_v60  ;;  %v5551_v3 = vmul.f32 %v4458_v62, %v5393_v31 }
 0x38c   :  { %v4460_v1 = vpop.eup %4459  ;;  %v4006_v36 = vpop.f32.mrf.mxu1 }
 0x38d   :  { %v5554_v37 = vmul.f32 %v4460_v1, %v5393_v31  ;;  %4473 = vtanh.f32 %v1518_v0  ;;  %v1533_v38 = vadd.f32 %v4006_v36, %v5376_v5  ;;  %3198 = vst.msk [vmem:[%s6159_s19 + $0x80] sm:$0xff] %vm105_vm0, %v5551_v3 }
 0x38e   :  { %v4462_v40 = vpop.eup %4461  ;;  %v1527_v41 = vpop.f32.mrf.mxu1 }
 0x38f   :  { %3201 = vst.msk [vmem:[%s6159_s19 + $0x98] sm:$0xff] %vm105_vm0, %v5554_v37  ;;  %v5568_v42 = vmul.f32 %v4462_v40, %v5393_v31  ;;  %4475 = vtanh.f32 %v1533_v38  ;;  %v1528_v44 = vadd.f32 %v5376_v5, %v1527_v41 }
 0x390   :  { %v4464_v45 = vpop.eup %4463  ;;  %v4009_v46 = vpop.f32.mrf.mxu1 }
 0x391   :  { %3200 = vst.msk [vmem:[%s6159_s19 + $0x90] sm:$0xff] %vm105_vm0, %v5568_v42  ;;  %v5577_v50 = vmul.f32 %v4464_v45, %v5393_v31  ;;  %v1543_v47 = vadd.f32 %v4009_v46, %v5376_v5  ;;  %4477 = vtanh.f32 %v1528_v44 }
 0x392   :  { %v4466_v51 = vpop.eup %4465  ;;  %v1537_v48 = vpop.f32.mrf.mxu1 }
 0x393   :  { %3203 = vst.msk [vmem:[%s6159_s19 + $0xa8] sm:$0xff] %vm105_vm0, %v5577_v50  ;;  %v5586_v53 = vmul.f32 %v4466_v51, %v5393_v31  ;;  %v1538_v54 = vadd.f32 %v5376_v5, %v1537_v48  ;;  %4479 = vtanh.f32 %v1543_v47 }
 0x394   :  { %v4468_v6 = vpop.eup %4467  ;;  %v4012_v7 = vpop.f32.mrf.mxu1 }
 0x395   :  { %3202 = vst.msk [vmem:[%s6159_s19 + $0xa0] sm:$0xff] %vm105_vm0, %v5586_v53  ;;  %v5595_v8 = vmul.f32 %v4468_v6, %v5393_v31  ;;  %v1553_v9 = vadd.f32 %v4012_v7, %v5376_v5  ;;  %4481 = vtanh.f32 %v1538_v54 }
 0x396   :  { %v4470_v11 = vpop.eup %4469  ;;  %v1547_v12 = vpop.f32.mrf.mxu1 }
 0x397   :  { %3205 = vst.msk [vmem:[%s6159_s19 + $0xb8] sm:$0xff] %vm105_vm0, %v5595_v8  ;;  %v5604_v13 = vmul.f32 %v4470_v11, %v5393_v31  ;;  %v1548_v15 = vadd.f32 %v5376_v5, %v1547_v12  ;;  %4483 = vtanh.f32 %v1553_v9 }
 0x398   :  { %v4472_v16 = vpop.eup %4471  ;;  %v4079_v17 = vpop.f32.mrf.mxu1 }
 0x399   :  { %3204 = vst.msk [vmem:[%s6159_s19 + $0xb0] sm:$0xff] %vm105_vm0, %v5604_v13  ;;  %v5618_v20 = vmul.f32 %v4472_v16, %v5393_v31  ;;  %4485 = vtanh.f32 %v1548_v15  ;;  %v2027_v24 = vadd.f32 %v4079_v17, %v5610_v19 }
 0x39a   :  { %v4474_v21 = vpop.eup %4473  ;;  %v2021_v5 = vpop.f32.mrf.mxu1 }
 0x39b   :  { %3207 = vst.msk [vmem:[%s6159_s19 + $0xc8] sm:$0xff] %vm105_vm0, %v5618_v20  ;;  %v5626_v23 = vmul.f32 %v4474_v21, %v5393_v31  ;;  %v2022_v27 = vadd.f32 %v5610_v19, %v2021_v5  ;;  %v2181_v56 = vmax.f32 %v2027_v24, 0.0 }
 0x39c   :  { %v4476_v25 = vpop.eup %4475  ;;  %v4082_v28 = vpop.f32.mrf.mxu1 }
 0x39d   :  { %3206 = vst.msk [vmem:[%s6159_s19 + $0xc0] sm:$0xff] %vm105_vm0, %v5626_v23  ;;  %v5636_v29 = vmul.f32 %v4476_v25, %v5393_v31  ;;  %v2180_v32 = vmax.f32 %v2022_v27, 0.0  ;;  %v2037_v57 = vadd.f32 %v4082_v28, %v5610_v19 }
 0x39e   :  { %v2031_v33 = vpop.f32.mrf.mxu1  ;;  %v4478_v34 = vpop.eup %4477 }
 0x39f   :  { %3209 = vst.msk [vmem:[%s6159_s19 + $0xd8] sm:$0xff] %vm105_vm0, %v5636_v29  ;;  %v2032_v58 = vadd.f32 %v5610_v19, %v2031_v33  ;;  %v5646_v61 = vmul.f32 %v4478_v34, %v5393_v31  ;;  %4133 = vmatprep.mubr.msk.f32.mxu0 %vm482_vm1, %v2180_v32  ;;  %v2183_v41 = vmax.f32 %v2037_v57, 0.0 }
 0x3a0   :  { %v4085_v62 = vpop.f32.mrf.mxu1  ;;  %v4480_v0 = vpop.eup %4479  ;;  %4134 = vmatmul.mubr.msk.f32.vlgmr.msra.gmra.mxu0 %vm482_vm1, %v2181_v56 }
 0x3a1   :  { %v2182_v1 = vmax.f32 %v2032_v58, 0.0  ;;  %3208 = vst.msk [vmem:[%s6159_s19 + $0xd0] sm:$0xff] %vm105_vm0, %v5646_v61  ;;  %v5656_v36 = vmul.f32 %v4480_v0, %v5393_v31  ;;  %v2047_v44 = vadd.f32 %v4085_v62, %v5610_v19 }
 0x3a2   :  { %v2041_v38 = vpop.f32.mrf.mxu1  ;;  %v4482_v40 = vpop.eup %4481 }
 0x3a3   :  { %v2042_v45 = vadd.f32 %v5610_v19, %v2041_v38  ;;  %4136 = vmatprep.mubr.msk.f32.mxu0 %vm482_vm1, %v2182_v1  ;;  %3211 = vst.msk [vmem:[%s6159_s19 + $0xe8] sm:$0xff] %vm105_vm0, %v5656_v36  ;;  %v5667_v46 = vmul.f32 %v4482_v40, %v5393_v31  ;;  %v2185_v9 = vmax.f32 %v2047_v44, 0.0 }
 0x3a4   :  { %v4088_v47 = vpop.f32.mrf.mxu1  ;;  %v4484_v51 = vpop.eup %4483  ;;  %4137 = vmatmul.mubr.msk.f32.gmra.mxu0 %vm482_vm1, %v2183_v41 }
 0x3a5   :  { %v2184_v48 = vmax.f32 %v2042_v45, 0.0  ;;  %3210 = vst.msk [vmem:[%s6159_s19 + $0xe0] sm:$0xff] %vm105_vm0, %v5667_v46  ;;  %v5676_v54 = vmul.f32 %v4484_v51, %v5393_v31  ;;  %v2057_v11 = vadd.f32 %v4088_v47, %v5610_v19 }
 0x3a6   :  { %v2051_v6 = vpop.f32.mrf.mxu1  ;;  %v4486_v7 = vpop.eup %4485 }
 0x3a7   :  { %v2052_v12 = vadd.f32 %v5610_v19, %v2051_v6  ;;  %4139 = vmatprep.mubr.msk.f32.mxu0 %vm482_vm1, %v2184_v48  ;;  %3213 = vst.msk [vmem:[%s6159_s19 + $0xf8] sm:$0xff] %vm105_vm0, %v5676_v54  ;;  %v5687_v15 = vmul.f32 %v4486_v7, %v5393_v31  ;;  %v2187_v5 = vmax.f32 %v2057_v11, 0.0 }
 0x3a8   :  { %v4091_v16 = vpop.f32.mrf.mxu1  ;;  %4140 = vmatmul.mubr.msk.f32.gmra.mxu0 %vm482_vm1, %v2185_v9 }
 0x3a9   :  { %v2186_v17 = vmax.f32 %v2052_v12, 0.0  ;;  %3212 = vst.msk [vmem:[%s6159_s19 + $0xf0] sm:$0xff] %vm105_vm0, %v5687_v15  ;;  %v2067_v24 = vadd.f32 %v4091_v16, %v5610_v19 }
 0x3aa   :  { %v2061_v21 = vpop.f32.mrf.mxu1 }
 0x3ab   :  { %v2062_v25 = vadd.f32 %v5610_v19, %v2061_v21  ;;  %4142 = vmatprep.mubr.msk.f32.mxu0 %vm482_vm1, %v2186_v17  ;;  %v2189_v33 = vmax.f32 %v2067_v24, 0.0 }
 0x3ac   :  { %v4094_v27 = vpop.f32.mrf.mxu1  ;;  %4143 = vmatmul.mubr.msk.f32.gmra.mxu0 %vm482_vm1, %v2187_v5 }
 0x3ad   :  { %v2188_v28 = vmax.f32 %v2062_v25, 0.0  ;;  %v2077_v34 = vadd.f32 %v4094_v27, %v5610_v19 }
 0x3ae   :  { %v2071_v32 = vpop.f32.mrf.mxu1 }
 0x3af   :  { %v2072_v56 = vadd.f32 %v5610_v19, %v2071_v32  ;;  %4145 = vmatprep.mubr.msk.f32.mxu0 %vm482_vm1, %v2188_v28  ;;  %v2191_v0 = vmax.f32 %v2077_v34, 0.0 }
 0x3b0   :  { %v4097_v57 = vpop.f32.mrf.mxu1  ;;  %4146 = vmatmul.mubr.msk.f32.gmra.mxu0 %vm482_vm1, %v2189_v33 }
 0x3b1   :  { %v2190_v58 = vmax.f32 %v2072_v56, 0.0  ;;  %v2087_v1 = vadd.f32 %v4097_v57, %v5610_v19 }
 0x3b2   :  { %v2081_v62 = vpop.f32.mrf.mxu1 }
 0x3b3   :  { %v2082_v38 = vadd.f32 %v5610_v19, %v2081_v62  ;;  %4148 = vmatprep.mubr.msk.f32.mxu0 %vm482_vm1, %v2190_v58  ;;  %v2193_v45 = vmax.f32 %v2087_v1, 0.0 }
 0x3b4   :  { %v4100_v40 = vpop.f32.mrf.mxu1  ;;  %4149 = vmatmul.mubr.msk.f32.gmra.mxu0 %vm482_vm1, %v2191_v0 }
 0x3b5   :  { %v2192_v41 = vmax.f32 %v2082_v38, 0.0  ;;  %v2097_v47 = vadd.f32 %v4100_v40, %v5610_v19 }
 0x3b6   :  { %v2091_v44 = vpop.f32.mrf.mxu1 }
 0x3b7   :  { %v2092_v51 = vadd.f32 %v5610_v19, %v2091_v44  ;;  %4151 = vmatprep.mubr.msk.f32.mxu0 %vm482_vm1, %v2192_v41  ;;  %v2195_v9 = vmax.f32 %v2097_v47, 0.0 }
 0x3b8   :  { %v4103_v48 = vpop.f32.mrf.mxu1  ;;  %4152 = vmatmul.mubr.msk.f32.gmra.mxu0 %vm482_vm1, %v2193_v45 }
 0x3b9   :  { %v2194_v6 = vmax.f32 %v2092_v51, 0.0  ;;  %v2107_v11 = vadd.f32 %v4103_v48, %v5610_v19 }
 0x3ba   :  { %v2101_v7 = vpop.f32.mrf.mxu1 }
 0x3bb   :  { %v2102_v12 = vadd.f32 %v5610_v19, %v2101_v7  ;;  %4154 = vmatprep.mubr.msk.f32.mxu0 %vm482_vm1, %v2194_v6  ;;  %v2197_v5 = vmax.f32 %v2107_v11, 0.0 }
 0x3bc   :  { %v4106_v16 = vpop.f32.mrf.mxu1  ;;  %4155 = vmatmul.mubr.msk.f32.gmra.mxu0 %vm482_vm1, %v2195_v9 }
 0x3bd   :  { %v2196_v17 = vmax.f32 %v2102_v12, 0.0  ;;  %v2117_v24 = vadd.f32 %v4106_v16, %v5610_v19 }
 0x3be   :  { %v2111_v21 = vpop.f32.mrf.mxu1 }
 0x3bf   :  { %v2112_v25 = vadd.f32 %v5610_v19, %v2111_v21  ;;  %4157 = vmatprep.mubr.msk.f32.mxu0 %vm482_vm1, %v2196_v17  ;;  %v2199_v33 = vmax.f32 %v2117_v24, 0.0 }
 0x3c0   :  { %v4109_v27 = vpop.f32.mrf.mxu1  ;;  %4158 = vmatmul.mubr.msk.f32.gmra.mxu0 %vm482_vm1, %v2197_v5 }
 0x3c1   :  { %v2198_v28 = vmax.f32 %v2112_v25, 0.0  ;;  %v2127_v34 = vadd.f32 %v4109_v27, %v5610_v19 }
 0x3c2   :  { %v2121_v32 = vpop.f32.mrf.mxu1 }
 0x3c3   :  { %v2122_v56 = vadd.f32 %v5610_v19, %v2121_v32  ;;  %4160 = vmatprep.mubr.msk.f32.mxu0 %vm482_vm1, %v2198_v28  ;;  %v2201_v0 = vmax.f32 %v2127_v34, 0.0 }
 0x3c4   :  { %v4112_v57 = vpop.f32.mrf.mxu1  ;;  %4161 = vmatmul.mubr.msk.f32.gmra.mxu0 %vm482_vm1, %v2199_v33 }
 0x3c5   :  { %v2200_v58 = vmax.f32 %v2122_v56, 0.0  ;;  %v2137_v1 = vadd.f32 %v4112_v57, %v5610_v19 }
 0x3c6   :  { %v2131_v62 = vpop.f32.mrf.mxu1 }
 0x3c7   :  { %v2132_v38 = vadd.f32 %v5610_v19, %v2131_v62  ;;  %4163 = vmatprep.mubr.msk.f32.mxu0 %vm482_vm1, %v2200_v58  ;;  %v2203_v45 = vmax.f32 %v2137_v1, 0.0  ;;  %v5748_v62 = vld [vmem:[%s6161_s16] ss:$0 sm:$0xff] }
 0x3c8   :  { %v4115_v40 = vpop.f32.mrf.mxu1  ;;  %4164 = vmatmul.mubr.msk.f32.gmra.mxu0 %vm482_vm1, %v2201_v0 }
 0x3c9   :  { %v2202_v41 = vmax.f32 %v2132_v38, 0.0  ;;  %v2147_v47 = vadd.f32 %v4115_v40, %v5610_v19 }
 0x3ca   :  { %v2141_v44 = vpop.f32.mrf.mxu1 }
 0x3cb   :  { %v2142_v51 = vadd.f32 %v5610_v19, %v2141_v44  ;;  %4166 = vmatprep.mubr.msk.f32.mxu0 %vm482_vm1, %v2202_v41  ;;  %v2205_v9 = vmax.f32 %v2147_v47, 0.0 }
 0x3cc   :  { %v4118_v48 = vpop.f32.mrf.mxu1  ;;  %4167 = vmatmul.mubr.msk.f32.gmra.mxu0 %vm482_vm1, %v2203_v45 }
 0x3cd   :  { %v2204_v6 = vmax.f32 %v2142_v51, 0.0  ;;  %v2157_v11 = vadd.f32 %v4118_v48, %v5610_v19 }
 0x3ce   :  { %v2151_v7 = vpop.f32.mrf.mxu1 }
 0x3cf   :  { %v2152_v12 = vadd.f32 %v5610_v19, %v2151_v7  ;;  %4169 = vmatprep.mubr.msk.f32.mxu0 %vm482_vm1, %v2204_v6  ;;  %v2207_v5 = vmax.f32 %v2157_v11, 0.0 }
 0x3d0   :  { %v4121_v16 = vpop.f32.mrf.mxu1  ;;  %4170 = vmatmul.mubr.msk.f32.gmra.mxu0 %vm482_vm1, %v2205_v9 }
 0x3d1   :  { %v2206_v17 = vmax.f32 %v2152_v12, 0.0  ;;  %v2167_v24 = vadd.f32 %v4121_v16, %v5610_v19 }
 0x3d2   :  { %v2161_v21 = vpop.f32.mrf.mxu1 }
 0x3d3   :  { %v2162_v25 = vadd.f32 %v5610_v19, %v2161_v21  ;;  %4172 = vmatprep.mubr.msk.f32.mxu0 %vm482_vm1, %v2206_v17  ;;  %v2209_v33 = vmax.f32 %v2167_v24, 0.0 }
 0x3d4   :  { %v4124_v27 = vpop.f32.mrf.mxu1  ;;  %4173 = vmatmul.mubr.msk.f32.gmra.mxu0 %vm482_vm1, %v2207_v5 }
 0x3d5   :  { %v2208_v28 = vmax.f32 %v2162_v25, 0.0  ;;  %v2177_v34 = vadd.f32 %v4124_v27, %v5610_v19 }
 0x3d6   :  { %v2171_v32 = vpop.f32.mrf.mxu1 }
 0x3d7   :  { %v2172_v56 = vadd.f32 %v5610_v19, %v2171_v32  ;;  %4175 = vmatprep.mubr.msk.f32.mxu0 %vm482_vm1, %v2208_v28  ;;  %v2211_v58 = vmax.f32 %v2177_v34, 0.0 }
 0x3d8   :  { %4176 = vmatmul.mubr.msk.f32.gmra.mxu0 %vm482_vm1, %v2209_v33 }
 0x3d9   :  { %v2210_v57 = vmax.f32 %v2172_v56, 0.0 }
 0x3db   :  { %4178 = vmatprep.mubr.msk.f32.mxu0 %vm482_vm1, %v2210_v57 }
 0x3dc   :  { %4179 = vmatmul.mubr.msk.f32.gmra.mxu0 %vm482_vm1, %v2211_v58 }
 0x460   :  { %v4135_v0 = vpop.f32.mrf.mxu0 }
 0x461   :  { %v2403_v1 = vadd.f32 %v4135_v0, %v5748_v62 }
 0x462   :  { %v2397_v38 = vpop.f32.mrf.mxu0 }
 0x463   :  { %v2398_v19 = vadd.f32 %v5748_v62, %v2397_v38  ;;  %v2557_v44 = vmax.f32 %v2403_v1, 0.0 }
 0x464   :  { %v4138_v40 = vpop.f32.mrf.mxu0 }
 0x465   :  { %v2556_v41 = vmax.f32 %v2398_v19, 0.0  ;;  %v2413_v45 = vadd.f32 %v4138_v40, %v5748_v62 }
 0x466   :  { %v2407_v47 = vpop.f32.mrf.mxu0 }
 0x467   :  { %v2408_v51 = vadd.f32 %v5748_v62, %v2407_v47  ;;  %4183 = vmatprep.mubr.msk.f32.mxu1 %vm482_vm1, %v2556_v41  ;;  %v2559_v7 = vmax.f32 %v2413_v45, 0.0 }
 0x468   :  { %v4141_v48 = vpop.f32.mrf.mxu0  ;;  %4184 = vmatmul.mubr.msk.f32.vlgmr.msra.gmra.mxu1 %vm482_vm1, %v2557_v44 }
 0x469   :  { %v2558_v6 = vmax.f32 %v2408_v51, 0.0  ;;  %v2423_v9 = vadd.f32 %v4141_v48, %v5748_v62 }
 0x46a   :  { %v2417_v11 = vpop.f32.mrf.mxu0 }
 0x46b   :  { %v2418_v12 = vadd.f32 %v5748_v62, %v2417_v11  ;;  %4186 = vmatprep.mubr.msk.f32.mxu1 %vm482_vm1, %v2558_v6  ;;  %v2561_v21 = vmax.f32 %v2423_v9, 0.0 }
 0x46c   :  { %v4144_v16 = vpop.f32.mrf.mxu0  ;;  %4187 = vmatmul.mubr.msk.f32.gmra.mxu1 %vm482_vm1, %v2559_v7 }
 0x46d   :  { %v2560_v17 = vmax.f32 %v2418_v12, 0.0  ;;  %v2433_v5 = vadd.f32 %v4144_v16, %v5748_v62 }
 0x46e   :  { %v2427_v24 = vpop.f32.mrf.mxu0 }
 0x46f   :  { %v2428_v25 = vadd.f32 %v5748_v62, %v2427_v24  ;;  %4189 = vmatprep.mubr.msk.f32.mxu1 %vm482_vm1, %v2560_v17  ;;  %v2563_v32 = vmax.f32 %v2433_v5, 0.0 }
 0x470   :  { %v4147_v27 = vpop.f32.mrf.mxu0  ;;  %4190 = vmatmul.mubr.msk.f32.gmra.mxu1 %vm482_vm1, %v2561_v21 }
 0x471   :  { %v2562_v28 = vmax.f32 %v2428_v25, 0.0  ;;  %v2443_v33 = vadd.f32 %v4147_v27, %v5748_v62 }
 0x472   :  { %v2437_v34 = vpop.f32.mrf.mxu0 }
 0x473   :  { %v2438_v56 = vadd.f32 %v5748_v62, %v2437_v34  ;;  %4192 = vmatprep.mubr.msk.f32.mxu1 %vm482_vm1, %v2562_v28  ;;  %v2565_v0 = vmax.f32 %v2443_v33, 0.0 }
 0x474   :  { %v4150_v57 = vpop.f32.mrf.mxu0  ;;  %4193 = vmatmul.mubr.msk.f32.gmra.mxu1 %vm482_vm1, %v2563_v32 }
 0x475   :  { %v2564_v58 = vmax.f32 %v2438_v56, 0.0  ;;  %v2453_v1 = vadd.f32 %v4150_v57, %v5748_v62 }
 0x476   :  { %v2447_v38 = vpop.f32.mrf.mxu0 }
 0x477   :  { %v2448_v19 = vadd.f32 %v5748_v62, %v2447_v38  ;;  %4195 = vmatprep.mubr.msk.f32.mxu1 %vm482_vm1, %v2564_v58  ;;  %v2567_v44 = vmax.f32 %v2453_v1, 0.0 }
 0x478   :  { %v4153_v40 = vpop.f32.mrf.mxu0  ;;  %4196 = vmatmul.mubr.msk.f32.gmra.mxu1 %vm482_vm1, %v2565_v0 }
 0x479   :  { %v2566_v41 = vmax.f32 %v2448_v19, 0.0  ;;  %v2463_v45 = vadd.f32 %v4153_v40, %v5748_v62 }
 0x47a   :  { %v2457_v47 = vpop.f32.mrf.mxu0 }
 0x47b   :  { %v2458_v51 = vadd.f32 %v5748_v62, %v2457_v47  ;;  %4198 = vmatprep.mubr.msk.f32.mxu1 %vm482_vm1, %v2566_v41  ;;  %v2569_v7 = vmax.f32 %v2463_v45, 0.0 }
 0x47c   :  { %v4156_v48 = vpop.f32.mrf.mxu0  ;;  %4199 = vmatmul.mubr.msk.f32.gmra.mxu1 %vm482_vm1, %v2567_v44 }
 0x47d   :  { %v2568_v6 = vmax.f32 %v2458_v51, 0.0  ;;  %v2473_v9 = vadd.f32 %v4156_v48, %v5748_v62 }
 0x47e   :  { %v2467_v11 = vpop.f32.mrf.mxu0 }
 0x47f   :  { %v2468_v12 = vadd.f32 %v5748_v62, %v2467_v11  ;;  %4201 = vmatprep.mubr.msk.f32.mxu1 %vm482_vm1, %v2568_v6  ;;  %v2571_v21 = vmax.f32 %v2473_v9, 0.0 }
 0x480   :  { %v4159_v16 = vpop.f32.mrf.mxu0  ;;  %4202 = vmatmul.mubr.msk.f32.gmra.mxu1 %vm482_vm1, %v2569_v7 }
 0x481   :  { %v2570_v17 = vmax.f32 %v2468_v12, 0.0  ;;  %v2483_v5 = vadd.f32 %v4159_v16, %v5748_v62 }
 0x482   :  { %v2477_v24 = vpop.f32.mrf.mxu0 }
 0x483   :  { %v2478_v25 = vadd.f32 %v5748_v62, %v2477_v24  ;;  %4204 = vmatprep.mubr.msk.f32.mxu1 %vm482_vm1, %v2570_v17  ;;  %v2573_v32 = vmax.f32 %v2483_v5, 0.0 }
 0x484   :  { %v4162_v27 = vpop.f32.mrf.mxu0  ;;  %4205 = vmatmul.mubr.msk.f32.gmra.mxu1 %vm482_vm1, %v2571_v21 }
 0x485   :  { %v2572_v28 = vmax.f32 %v2478_v25, 0.0  ;;  %v2493_v33 = vadd.f32 %v4162_v27, %v5748_v62 }
 0x486   :  { %v2487_v34 = vpop.f32.mrf.mxu0 }
 0x487   :  { %v2488_v56 = vadd.f32 %v5748_v62, %v2487_v34  ;;  %4207 = vmatprep.mubr.msk.f32.mxu1 %vm482_vm1, %v2572_v28  ;;  %v2575_v0 = vmax.f32 %v2493_v33, 0.0 }
 0x488   :  { %v4165_v57 = vpop.f32.mrf.mxu0  ;;  %4208 = vmatmul.mubr.msk.f32.gmra.mxu1 %vm482_vm1, %v2573_v32 }
 0x489   :  { %v2574_v58 = vmax.f32 %v2488_v56, 0.0  ;;  %v2503_v1 = vadd.f32 %v4165_v57, %v5748_v62 }
 0x48a   :  { %v2497_v38 = vpop.f32.mrf.mxu0 }
 0x48b   :  { %v2498_v19 = vadd.f32 %v5748_v62, %v2497_v38  ;;  %4210 = vmatprep.mubr.msk.f32.mxu1 %vm482_vm1, %v2574_v58  ;;  %v2577_v44 = vmax.f32 %v2503_v1, 0.0 }
 0x48c   :  { %v4168_v40 = vpop.f32.mrf.mxu0  ;;  %4211 = vmatmul.mubr.msk.f32.gmra.mxu1 %vm482_vm1, %v2575_v0 }
 0x48d   :  { %v2576_v41 = vmax.f32 %v2498_v19, 0.0  ;;  %v2513_v45 = vadd.f32 %v4168_v40, %v5748_v62 }
 0x48e   :  { %v2507_v47 = vpop.f32.mrf.mxu0 }
 0x48f   :  { %v2508_v51 = vadd.f32 %v5748_v62, %v2507_v47  ;;  %4213 = vmatprep.mubr.msk.f32.mxu1 %vm482_vm1, %v2576_v41  ;;  %v2579_v7 = vmax.f32 %v2513_v45, 0.0  ;;  %v3022_v45 = vmul.f32 1.442695, %v5406_v59  ;;  %v3028_v47 = vmul.f32 1.442695, %v5415_v63 }
 0x490   :  { %v4171_v48 = vpop.f32.mrf.mxu0  ;;  %4214 = vmatmul.mubr.msk.f32.gmra.mxu1 %vm482_vm1, %v2577_v44  ;;  %v3024_v44 = vmul.f32 1.442695, %v5397_v55  ;;  %v3034_v55 = vmul.f32 1.442695, %v5460_v52  ;;  %v5825_v59 = vld [vmem:[%s6162_s17] ss:$0 sm:$0xff] }
 0x491   :  { %v2578_v6 = vmax.f32 %v2508_v51, 0.0  ;;  %v2523_v9 = vadd.f32 %v4171_v48, %v5748_v62  ;;  %v3032_v51 = vmul.f32 1.442695, %v5433_v39  ;;  %v3030_v48 = vmul.f32 1.442695, %v5442_v43 }
 0x492   :  { %v2517_v11 = vpop.f32.mrf.mxu0  ;;  %4487 = vpow2.f32 %v3024_v44  ;;  %v3038_v39 = vmul.f32 1.442695, %v5479_v10  ;;  %v4552_v10 = vld [vmem:[%s6173_s23] sm:$0xff] }
 0x493   :  { %v2518_v12 = vadd.f32 %v5748_v62, %v2517_v11  ;;  %4216 = vmatprep.mubr.msk.f32.mxu1 %vm482_vm1, %v2578_v6  ;;  %v2581_v21 = vmax.f32 %v2523_v9, 0.0  ;;  %4489 = vpow2.f32 %v3022_v45  ;;  %v3036_v6 = vmul.f32 1.442695, %v5451_v49  ;;  %v4551_v49 = vld [vmem:[%s6173_s23 + $0x8] sm:$0xff] }
 0x494   :  { %v4174_v16 = vpop.f32.mrf.mxu0  ;;  %4217 = vmatmul.mubr.msk.f32.gmra.mxu1 %vm482_vm1, %v2579_v7  ;;  %4491 = vpow2.f32 %v3028_v47 }
 0x495   :  { %v2580_v17 = vmax.f32 %v2518_v12, 0.0  ;;  %v2533_v5 = vadd.f32 %v4174_v16, %v5748_v62  ;;  %v3044_v16 = vmul.f32 1.442695, %v5488_v14  ;;  %v3048_v14 = vmul.f32 1.442695, %v5506_v22 }
 0x496   :  { %v2527_v24 = vpop.f32.mrf.mxu0  ;;  %v3046_v22 = vmul.f32 1.442695, %v5515_v26  ;;  %v4555_v26 = vld [vmem:[%s6173_s23 + $0x28] sm:$0xff] }
 0x497   :  { %v2528_v25 = vadd.f32 %v5748_v62, %v2527_v24  ;;  %4219 = vmatprep.mubr.msk.f32.mxu1 %vm482_vm1, %v2580_v17  ;;  %v2583_v32 = vmax.f32 %v2533_v5, 0.0 }
 0x498   :  { %v4177_v27 = vpop.f32.mrf.mxu0  ;;  %4220 = vmatmul.mubr.msk.f32.gmra.mxu1 %vm482_vm1, %v2581_v21 }
 0x499   :  { %v2582_v28 = vmax.f32 %v2528_v25, 0.0  ;;  %v2543_v33 = vadd.f32 %v4177_v27, %v5748_v62  ;;  %v3042_v25 = vmul.f32 1.442695, %v5497_v18 }
 0x49a   :  { %v2537_v34 = vpop.f32.mrf.mxu0 }
 0x49b   :  { %v2538_v56 = vadd.f32 %v5748_v62, %v2537_v34  ;;  %4222 = vmatprep.mubr.msk.f32.mxu1 %vm482_vm1, %v2582_v28  ;;  %v2585_v0 = vmax.f32 %v2543_v33, 0.0  ;;  %v4553_v33 = vld [vmem:[%s6173_s23 + $0x18] sm:$0xff] }
 0x49c   :  { %v4180_v57 = vpop.f32.mrf.mxu0  ;;  %4223 = vmatmul.mubr.msk.f32.gmra.mxu1 %vm482_vm1, %v2583_v32 }
 0x49d   :  { %v2584_v58 = vmax.f32 %v2538_v56, 0.0  ;;  %v2553_v1 = vadd.f32 %v4180_v57, %v5748_v62 }
 0x49e   :  { %v2547_v38 = vpop.f32.mrf.mxu0 }
 0x49f   :  { %v2548_v19 = vadd.f32 %v5748_v62, %v2547_v38  ;;  %4225 = vmatprep.mubr.msk.f32.mxu1 %vm482_vm1, %v2584_v58  ;;  %v2587_v41 = vmax.f32 %v2553_v1, 0.0  ;;  %v3026_v62 = vmul.f32 1.442695, %v5424_v4  ;;  %v4488_v63 = vpop.eup %4487  ;;  %v3040_v4 = vmul.f32 1.442695, %v5469_v2  ;;  %v4554_v1 = vld [vmem:[%s6173_s23 + $0x10] sm:$0xff] }
 0x4a0   :  { %4226 = vmatmul.mubr.msk.f32.gmra.mxu1 %vm482_vm1, %v2585_v0  ;;  %v4490_v43 = vpop.eup %4489  ;;  %v3087_v52 = vmul.f32 %v4551_v49, %v4488_v63 }
 0x4a1   :  { %v2586_v40 = vmax.f32 %v2548_v19, 0.0  ;;  %4493 = vpow2.f32 %v3026_v62  ;;  %v4492_v12 = vpop.eup %4491  ;;  %v3086_v21 = vmul.f32 %v4552_v10, %v4490_v43 }
 0x4a2   :  { %4495 = vpow2.f32 %v3032_v51  ;;  %v3089_v34 = vmul.f32 %v4553_v33, %v4492_v12  ;;  %v4557_v12 = vld [vmem:[%s6173_s23 + $0x38] sm:$0xff] }
 0x4a3   :  { %4228 = vmatprep.mubr.msk.f32.mxu1 %vm482_vm1, %v2586_v40  ;;  %4497 = vpow2.f32 %v3030_v48  ;;  %v3052_v48 = vmul.f32 1.442695, %v5524_v30  ;;  %v3050_v30 = vmul.f32 1.442695, %v5533_v35 }
 0x4a4   :  { %4229 = vmatmul.mubr.msk.f32.gmra.mxu1 %vm482_vm1, %v2587_v41  ;;  %4499 = vpow2.f32 %v3036_v6 }
 0x4a5   :  { %4501 = vpow2.f32 %v3034_v55 }
 0x4a6   :  { %4503 = vpow2.f32 %v3040_v4  ;;  %v4556_v4 = vld [vmem:[%s6173_s23 + $0x20] sm:$0xff] }
 0x4a7   :  { %4505 = vpow2.f32 %v3038_v39 }
 0x4a8   :  { %4507 = vpow2.f32 %v3044_v16 }
 0x4a9   :  { %4509 = vpow2.f32 %v3042_v25 }
 0x4aa   :  { %4511 = vpow2.f32 %v3048_v14 }
 0x4ab   :  { %4513 = vpow2.f32 %v3046_v22 }
 0x4ac   :  { %4515 = vpow2.f32 %v3052_v48 }
 0x4ad   :  { %4517 = vpow2.f32 %v3050_v30 }
 0x4ae   :  { %v4494_v24 = vpop.eup %4493 }
 0x4af   :  { %v4496_v57 = vpop.eup %4495  ;;  %v3088_v38 = vmul.f32 %v4554_v1, %v4494_v24 }
 0x4b0   :  { %v4498_v40 = vpop.eup %4497  ;;  %v3091_v47 = vmul.f32 %v4555_v26, %v4496_v57  ;;  %v4560_v57 = vld [vmem:[%s6173_s23 + $0x48] sm:$0xff] }
 0x4b1   :  { %v4500_v51 = vpop.eup %4499  ;;  %v3090_v39 = vmul.f32 %v4556_v4, %v4498_v40 }
 0x4b2   :  { %v4502_v43 = vpop.eup %4501  ;;  %v3093_v16 = vmul.f32 %v4557_v12, %v4500_v51  ;;  %v4562_v51 = vld [vmem:[%s6173_s23 + $0x58] sm:$0xff] }
 0x4b3   :  { %v4504_v10 = vpop.eup %4503 }
 0x528   :  { %v4185_v7 = vpop.f32.mrf.mxu1 }
 0x529   :  { %v2767_v9 = vadd.f32 %v4185_v7, %v5825_v59 }
 0x52a   :  { %v2761_v11 = vpop.f32.mrf.mxu1 }
 0x52b   :  { %v2927_v17 = vmul.f32 %v5393_v31, %v2767_v9  ;;  %v2762_v2 = vadd.f32 %v5825_v59, %v2761_v11  ;;  %v3056_v11 = vmul.f32 1.442695, %v5542_v60 }
 0x52c   :  { %v4188_v5 = vpop.f32.mrf.mxu1 }
 0x52d   :  { %v3119_v27 = vadd.f32 %v3087_v52, %v2927_v17  ;;  %v2926_v28 = vmul.f32 %v5393_v31, %v2762_v2  ;;  %v2777_v32 = vadd.f32 %v4188_v5, %v5825_v59  ;;  %v4559_v5 = vld [vmem:[%s6173_s23 + $0x30] sm:$0xff]  ;;  %4519 = vpow2.f32 %v3056_v11  ;;  %v4564_v11 = vld [vmem:[%s6173_s23 + $0x68] sm:$0xff] }
 0x52e   :  { %v2771_v56 = vpop.f32.mrf.mxu1  ;;  %v3092_v24 = vmul.f32 %v4559_v5, %v4502_v43 }
 0x52f   :  { %3151 = vst.msk [vmem:[%s6163_s18 + $0x8] sm:$0xff] %vm105_vm0, %v3119_v27  ;;  %v3118_v18 = vadd.f32 %v3086_v21, %v2926_v28  ;;  %v2929_v58 = vmul.f32 %v5393_v31, %v2777_v32  ;;  %v2772_v0 = vadd.f32 %v5825_v59, %v2771_v56  ;;  %v3054_v21 = vmul.f32 1.442695, %v5551_v3  ;;  %v4506_v27 = vpop.eup %4505 }
 0x530   :  { %v4191_v19 = vpop.f32.mrf.mxu1  ;;  %v3060_v3 = vmul.f32 1.442695, %v5554_v37  ;;  %v3058_v37 = vmul.f32 1.442695, %v5568_v42  ;;  %v3064_v42 = vmul.f32 1.442695, %v5577_v50 }
 0x531   :  { %3150 = vst.msk [vmem:[%s6163_s18] sm:$0xff] %vm105_vm0, %v3118_v18  ;;  %v3121_v41 = vadd.f32 %v3089_v34, %v2929_v58  ;;  %v2928_v44 = vmul.f32 %v5393_v31, %v2772_v0  ;;  %v2787_v45 = vadd.f32 %v4191_v19, %v5825_v59  ;;  %v3095_v18 = vmul.f32 %v4560_v57, %v4504_v10  ;;  %v4508_v0 = vpop.eup %4507  ;;  %v4561_v19 = vld [vmem:[%s6173_s23 + $0x40] sm:$0xff] }
 0x532   :  { %v2781_v62 = vpop.f32.mrf.mxu1  ;;  %4521 = vpow2.f32 %v3054_v21  ;;  %v3094_v40 = vmul.f32 %v4561_v19, %v4506_v27  ;;  %v3097_v48 = vmul.f32 %v4562_v51, %v4508_v0  ;;  %v3062_v50 = vmul.f32 1.442695, %v5586_v53  ;;  %v4565_v10 = vld [vmem:[%s6173_s23 + $0x60] sm:$0xff] }
 0x533   :  { %3153 = vst.msk [vmem:[%s6163_s18 + $0x18] sm:$0xff] %vm105_vm0, %v3121_v41  ;;  %v3120_v6 = vadd.f32 %v3088_v38, %v2928_v44  ;;  %v2931_v55 = vmul.f32 %v5393_v31, %v2787_v45  ;;  %v2782_v63 = vadd.f32 %v5825_v59, %v2781_v62  ;;  %v4510_v44 = vpop.eup %4509  ;;  %4523 = vpow2.f32 %v3060_v3 }
 0x534   :  { %v4194_v7 = vpop.f32.mrf.mxu1  ;;  %v4512_v26 = vpop.eup %4511  ;;  %4525 = vpow2.f32 %v3058_v37  ;;  %v3068_v53 = vmul.f32 1.442695, %v5595_v8  ;;  %v3066_v8 = vmul.f32 1.442695, %v5604_v13  ;;  %v3072_v13 = vmul.f32 1.442695, %v5618_v20 }
 0x535   :  { %3152 = vst.msk [vmem:[%s6163_s18 + $0x10] sm:$0xff] %vm105_vm0, %v3120_v6  ;;  %v3123_v9 = vadd.f32 %v3091_v47, %v2931_v55  ;;  %v2930_v49 = vmul.f32 %v5393_v31, %v2782_v63  ;;  %v2797_v52 = vadd.f32 %v4194_v7, %v5825_v59  ;;  %v5893_v31 = vld [vmem:[%s6158_s1] ss:$0 sm:$0xff]  ;;  %v4514_v63 = vpop.eup %4513  ;;  %v4563_v7 = vld [vmem:[%s6173_s23 + $0x50] sm:$0xff]  ;;  %4527 = vpow2.f32 %v3064_v42 }
 0x536   :  { %v2791_v17 = vpop.f32.mrf.mxu1  ;;  %v3096_v43 = vmul.f32 %v4563_v7, %v4510_v44  ;;  %v3099_v12 = vmul.f32 %v4564_v11, %v4512_v26  ;;  %4529 = vpow2.f32 %v3062_v50  ;;  %v3098_v21 = vmul.f32 %v4565_v10, %v4514_v63  ;;  %v4569_v42 = vld [vmem:[%s6173_s23 + $0x80] sm:$0xff]  ;;  %v4570_v50 = vld [vmem:[%s6173_s23 + $0x98] sm:$0xff] }
 0x537   :  { %3155 = vst.msk [vmem:[%s6163_s18 + $0x28] sm:$0xff] %vm105_vm0, %v3123_v9  ;;  %v3122_v35 = vadd.f32 %v3090_v39, %v2930_v49  ;;  %v2933_v60 = vmul.f32 %v5893_v31, %v2797_v52  ;;  %v2792_v2 = vadd.f32 %v5825_v59, %v2791_v17  ;;  %v4516_v17 = vpop.eup %4515  ;;  %4531 = vpow2.f32 %v3068_v53  ;;  %v4573_v10 = vld [vmem:[%s6173_s23 + $0xa0] sm:$0xff] }
 0x538   :  { %v4197_v25 = vpop.f32.mrf.mxu1  ;;  %4533 = vpow2.f32 %v3066_v8  ;;  %v3070_v20 = vmul.f32 1.442695, %v5626_v23  ;;  %v4568_v23 = vld [vmem:[%s6173_s23 + $0x88] sm:$0xff]  ;;  %v3076_v19 = vmul.f32 1.442695, %v5636_v29 }
 0x539   :  { %3154 = vst.msk [vmem:[%s6163_s18 + $0x20] sm:$0xff] %vm105_vm0, %v3122_v35  ;;  %v3125_v28 = vadd.f32 %v3093_v16, %v2933_v60  ;;  %v2932_v32 = vmul.f32 %v5893_v31, %v2792_v2  ;;  %v2807_v14 = vadd.f32 %v4197_v25, %v5825_v59  ;;  %4535 = vpow2.f32 %v3072_v13 }
 0x53a   :  { %v2801_v33 = vpop.f32.mrf.mxu1  ;;  %4537 = vpow2.f32 %v3070_v20  ;;  %v3074_v29 = vmul.f32 1.442695, %v5646_v61  ;;  %v3084_v8 = vmul.f32 1.442695, %v5676_v54  ;;  %v3082_v54 = vmul.f32 1.442695, %v5687_v15 }
 0x53b   :  { %3157 = vst.msk [vmem:[%s6163_s18 + $0x38] sm:$0xff] %vm105_vm0, %v3125_v28  ;;  %v3124_v34 = vadd.f32 %v3092_v24, %v2932_v32  ;;  %v2935_v56 = vmul.f32 %v5893_v31, %v2807_v14  ;;  %v2802_v58 = vadd.f32 %v5825_v59, %v2801_v33  ;;  %v4518_v24 = vpop.eup %4517  ;;  %v4566_v14 = vld [vmem:[%s6173_s23 + $0x78] sm:$0xff]  ;;  %4539 = vpow2.f32 %v3076_v19 }
 0x53c   :  { %v4200_v22 = vpop.f32.mrf.mxu1  ;;  %v4520_v27 = vpop.eup %4519  ;;  %v3101_v3 = vmul.f32 %v4566_v14, %v4516_v17  ;;  %4541 = vpow2.f32 %v3074_v29 }
 0x53d   :  { %3156 = vst.msk [vmem:[%s6163_s18 + $0x30] sm:$0xff] %vm105_vm0, %v3124_v34  ;;  %v3127_v1 = vadd.f32 %v3095_v18, %v2935_v56  ;;  %v2934_v38 = vmul.f32 %v5893_v31, %v2802_v58  ;;  %v2817_v41 = vadd.f32 %v4200_v22, %v5825_v59  ;;  %v4567_v58 = vld [vmem:[%s6173_s23 + $0x70] sm:$0xff]  ;;  %v3103_v22 = vmul.f32 %v4568_v23, %v4520_v27 }
 0x53e   :  { %v2811_v45 = vpop.f32.mrf.mxu1  ;;  %v3100_v0 = vmul.f32 %v4567_v58, %v4518_v24 }
 0x53f   :  { %3159 = vst.msk [vmem:[%s6163_s18 + $0x48] sm:$0xff] %vm105_vm0, %v3127_v1  ;;  %v3126_v47 = vadd.f32 %v3094_v40, %v2934_v38  ;;  %v2937_v62 = vmul.f32 %v5893_v31, %v2817_v41  ;;  %v2812_v6 = vadd.f32 %v5825_v59, %v2811_v45  ;;  %v4522_v56 = vpop.eup %4521 }
 0x540   :  { %v4203_v55 = vpop.f32.mrf.mxu1  ;;  %v4524_v38 = vpop.eup %4523  ;;  %v3102_v45 = vmul.f32 %v4569_v42, %v4522_v56 }
 0x541   :  { %3158 = vst.msk [vmem:[%s6163_s18 + $0x40] sm:$0xff] %vm105_vm0, %v3126_v47  ;;  %v3129_v4 = vadd.f32 %v3097_v48, %v2937_v62  ;;  %v2936_v39 = vmul.f32 %v5893_v31, %v2812_v6  ;;  %v2827_v30 = vadd.f32 %v4203_v55, %v5825_v59  ;;  %v4526_v47 = vpop.eup %4525  ;;  %v3080_v6 = vmul.f32 1.442695, %v5656_v36 }
 0x542   :  { %v2821_v9 = vpop.f32.mrf.mxu1  ;;  %v3105_v55 = vmul.f32 %v4570_v50, %v4524_v38  ;;  %v3078_v36 = vmul.f32 1.442695, %v5667_v46  ;;  %v4572_v46 = vld [vmem:[%s6173_s23 + $0xa8] sm:$0xff] }
 0x543   :  { %3161 = vst.msk [vmem:[%s6163_s18 + $0x58] sm:$0xff] %vm105_vm0, %v3129_v4  ;;  %v3128_v49 = vadd.f32 %v3096_v43, %v2936_v39  ;;  %v2939_v52 = vmul.f32 %v5893_v31, %v2827_v30  ;;  %v2822_v16 = vadd.f32 %v5825_v59, %v2821_v9  ;;  %v4528_v4 = vpop.eup %4527  ;;  %v4571_v43 = vld [vmem:[%s6173_s23 + $0x90] sm:$0xff]  ;;  %4543 = vpow2.f32 %v3080_v6  ;;  %v4576_v38 = vld [vmem:[%s6173_s23 + $0xc8] sm:$0xff] }
 0x544   :  { %v4206_v35 = vpop.f32.mrf.mxu1  ;;  %v3104_v30 = vmul.f32 %v4571_v43, %v4526_v47  ;;  %v4530_v9 = vpop.eup %4529  ;;  %4545 = vpow2.f32 %v3078_v36  ;;  %v4579_v43 = vld [vmem:[%s6173_s23 + $0xd0] sm:$0xff] }
 0x545   :  { %3160 = vst.msk [vmem:[%s6163_s18 + $0x50] sm:$0xff] %vm105_vm0, %v3128_v49  ;;  %v3131_v60 = vadd.f32 %v3099_v12, %v2939_v52  ;;  %v2938_v2 = vmul.f32 %v5893_v31, %v2822_v16  ;;  %v2837_v5 = vadd.f32 %v4206_v35, %v5825_v59  ;;  %v3107_v12 = vmul.f32 %v4572_v46, %v4528_v4  ;;  %v4532_v17 = vpop.eup %4531 }
 0x546   :  { %v2831_v25 = vpop.f32.mrf.mxu1  ;;  %v4534_v24 = vpop.eup %4533  ;;  %4547 = vpow2.f32 %v3084_v8 }
 0x547   :  { %3163 = vst.msk [vmem:[%s6163_s18 + $0x68] sm:$0xff] %vm105_vm0, %v3131_v60  ;;  %v3130_v28 = vadd.f32 %v3098_v21, %v2938_v2  ;;  %v2941_v32 = vmul.f32 %v5893_v31, %v2837_v5  ;;  %v2832_v33 = vadd.f32 %v5825_v59, %v2831_v25  ;;  %v3106_v21 = vmul.f32 %v4573_v10, %v4530_v9 }
 0x548   :  { %v4209_v34 = vpop.f32.mrf.mxu1  ;;  %4549 = vpow2.f32 %v3082_v54 }
 0x549   :  { %3162 = vst.msk [vmem:[%s6163_s18 + $0x60] sm:$0xff] %vm105_vm0, %v3130_v28  ;;  %v3133_v57 = vadd.f32 %v3101_v3, %v2941_v32  ;;  %v2940_v18 = vmul.f32 %v5893_v31, %v2832_v33  ;;  %v2847_v37 = vadd.f32 %v4209_v34, %v5825_v59  ;;  %v4574_v28 = vld [vmem:[%s6173_s23 + $0xb8] sm:$0xff]  ;;  %v4536_v3 = vpop.eup %4535  ;;  %v4575_v34 = vld [vmem:[%s6173_s23 + $0xb0] sm:$0xff] }
 0x54a   :  { %v2841_v1 = vpop.f32.mrf.mxu1  ;;  %v3109_v32 = vmul.f32 %v4574_v28, %v4532_v17  ;;  %v3108_v56 = vmul.f32 %v4575_v34, %v4534_v24  ;;  %v3111_v19 = vmul.f32 %v4576_v38, %v4536_v3 }
 0x54b   :  { %3165 = vst.msk [vmem:[%s6163_s18 + $0x78] sm:$0xff] %vm105_vm0, %v3133_v57  ;;  %v3132_v40 = vadd.f32 %v3100_v0, %v2940_v18  ;;  %v2943_v41 = vmul.f32 %v5893_v31, %v2847_v37  ;;  %v2842_v44 = vadd.f32 %v5825_v59, %v2841_v1  ;;  %v4538_v18 = vpop.eup %4537 }
 0x54c   :  { %v4212_v26 = vpop.f32.mrf.mxu1 }
 0x54d   :  { %3164 = vst.msk [vmem:[%s6163_s18 + $0x70] sm:$0xff] %vm105_vm0, %v3132_v40  ;;  %v3135_v62 = vadd.f32 %v3103_v22, %v2943_v41  ;;  %v2942_v51 = vmul.f32 %v5893_v31, %v2842_v44  ;;  %v2857_v48 = vadd.f32 %v4212_v26, %v5825_v59  ;;  %v4540_v41 = vpop.eup %4539  ;;  %v4577_v26 = vld [vmem:[%s6173_s23 + $0xc0] sm:$0xff] }
 0x54e   :  { %v2851_v63 = vpop.f32.mrf.mxu1  ;;  %v3110_v47 = vmul.f32 %v4577_v26, %v4538_v18 }
 0x54f   :  { %3167 = vst.msk [vmem:[%s6163_s18 + $0x88] sm:$0xff] %vm105_vm0, %v3135_v62  ;;  %v3134_v61 = vadd.f32 %v3102_v45, %v2942_v51  ;;  %v2945_v39 = vmul.f32 %v5893_v31, %v2857_v48  ;;  %v2852_v7 = vadd.f32 %v5825_v59, %v2851_v63  ;;  %v4542_v62 = vpop.eup %4541 }
 0x550   :  { %v4215_v53 = vpop.f32.mrf.mxu1  ;;  %v4544_v48 = vpop.eup %4543 }
 0x551   :  { %3166 = vst.msk [vmem:[%s6163_s18 + $0x80] sm:$0xff] %vm105_vm0, %v3134_v61  ;;  %v3137_v49 = vadd.f32 %v3105_v55, %v2945_v39  ;;  %v2944_v52 = vmul.f32 %v5893_v31, %v2852_v7  ;;  %v2867_v11 = vadd.f32 %v4215_v53, %v5825_v59  ;;  %v4578_v55 = vld [vmem:[%s6173_s23 + $0xd8] sm:$0xff]  ;;  %v4546_v39 = vpop.eup %4545 }
 0x552   :  { %v2861_v16 = vpop.f32.mrf.mxu1  ;;  %v3113_v63 = vmul.f32 %v4578_v55, %v4540_v41 }
 0x553   :  { %3169 = vst.msk [vmem:[%s6163_s18 + $0x98] sm:$0xff] %vm105_vm0, %v3137_v49  ;;  %v3136_v35 = vadd.f32 %v3104_v30, %v2944_v52  ;;  %v2947_v60 = vmul.f32 %v5893_v31, %v2867_v11  ;;  %v2862_v2 = vadd.f32 %v5825_v59, %v2861_v16  ;;  %v3112_v30 = vmul.f32 %v4579_v43, %v4542_v62  ;;  %v4580_v11 = vld [vmem:[%s6173_s23 + $0xe8] sm:$0xff]  ;;  %v4548_v16 = vpop.eup %4547 }
 0x554   :  { %v4218_v5 = vpop.f32.mrf.mxu1  ;;  %v3115_v46 = vmul.f32 %v4580_v11, %v4544_v48 }
 0x555   :  { %3168 = vst.msk [vmem:[%s6163_s18 + $0x90] sm:$0xff] %vm105_vm0, %v3136_v35  ;;  %v3139_v13 = vadd.f32 %v3107_v12, %v2947_v60  ;;  %v2946_v25 = vmul.f32 %v5893_v31, %v2862_v2  ;;  %v2877_v27 = vadd.f32 %v4218_v5, %v5825_v59  ;;  %v4581_v60 = vld [vmem:[%s6173_s23 + $0xe0] sm:$0xff] }
 0x556   :  { %v2871_v14 = vpop.f32.mrf.mxu1  ;;  %v3114_v2 = vmul.f32 %v4581_v60, %v4546_v39 }
 0x557   :  { %3171 = vst.msk [vmem:[%s6163_s18 + $0xa8] sm:$0xff] %vm105_vm0, %v3139_v13  ;;  %v3138_v15 = vadd.f32 %v3106_v21, %v2946_v25  ;;  %v2949_v33 = vmul.f32 %v5893_v31, %v2877_v27  ;;  %v2872_v20 = vadd.f32 %v5825_v59, %v2871_v14  ;;  %v4550_v21 = vpop.eup %4549  ;;  %v4582_v13 = vld [vmem:[%s6173_s23 + $0xf8] sm:$0xff]  ;;  %v4583_v14 = vld [vmem:[%s6173_s23 + $0xf0] sm:$0xff] }
 0x558   :  { %v4221_v57 = vpop.f32.mrf.mxu1  ;;  %v3117_v25 = vmul.f32 %v4582_v13, %v4548_v16  ;;  %v3116_v3 = vmul.f32 %v4583_v14, %v4550_v21 }
 0x559   :  { %3170 = vst.msk [vmem:[%s6163_s18 + $0xa0] sm:$0xff] %vm105_vm0, %v3138_v15  ;;  %v3141_v58 = vadd.f32 %v3109_v32, %v2949_v33  ;;  %v2948_v0 = vmul.f32 %v5893_v31, %v2872_v20  ;;  %v2887_v37 = vadd.f32 %v4221_v57, %v5825_v59 }
 0x55a   :  { %v2881_v23 = vpop.f32.mrf.mxu1 }
 0x55b   :  { %3173 = vst.msk [vmem:[%s6163_s18 + $0xb8] sm:$0xff] %vm105_vm0, %v3141_v58  ;;  %v3140_v22 = vadd.f32 %v3108_v56, %v2948_v0  ;;  %v2951_v1 = vmul.f32 %v5893_v31, %v2887_v37  ;;  %v2882_v40 = vadd.f32 %v5825_v59, %v2881_v23 }
 0x55c   :  { %v4224_v44 = vpop.f32.mrf.mxu1 }
 0x55d   :  { %3172 = vst.msk [vmem:[%s6163_s18 + $0xb0] sm:$0xff] %vm105_vm0, %v3140_v22  ;;  %v3143_v42 = vadd.f32 %v3111_v19, %v2951_v1  ;;  %v2950_v45 = vmul.f32 %v5893_v31, %v2882_v40  ;;  %v2897_v29 = vadd.f32 %v4224_v44, %v5825_v59 }
 0x55e   :  { %v2891_v51 = vpop.f32.mrf.mxu1 }
 0x55f   :  { %3175 = vst.msk [vmem:[%s6163_s18 + $0xc8] sm:$0xff] %vm105_vm0, %v3143_v42  ;;  %v3142_v6 = vadd.f32 %v3110_v47, %v2950_v45  ;;  %v2953_v50 = vmul.f32 %v5893_v31, %v2897_v29  ;;  %v2892_v4 = vadd.f32 %v5825_v59, %v2891_v51 }
 0x560   :  { %v4227_v61 = vpop.f32.mrf.mxu1 }
 0x561   :  { %3174 = vst.msk [vmem:[%s6163_s18 + $0xc0] sm:$0xff] %vm105_vm0, %v3142_v6  ;;  %v3145_v7 = vadd.f32 %v3113_v63, %v2953_v50  ;;  %v2952_v36 = vmul.f32 %v5893_v31, %v2892_v4  ;;  %v2907_v53 = vadd.f32 %v4227_v61, %v5825_v59 }
 0x562   :  { %v2901_v9 = vpop.f32.mrf.mxu1 }
 0x563   :  { %3177 = vst.msk [vmem:[%s6163_s18 + $0xd8] sm:$0xff] %vm105_vm0, %v3145_v7  ;;  %v3144_v49 = vadd.f32 %v3112_v30, %v2952_v36  ;;  %v2955_v52 = vmul.f32 %v5893_v31, %v2907_v53  ;;  %v2902_v12 = vadd.f32 %v5825_v59, %v2901_v9 }
 0x564   :  { %v4230_v17 = vpop.f32.mrf.mxu1 }
 0x565   :  { %3176 = vst.msk [vmem:[%s6163_s18 + $0xd0] sm:$0xff] %vm105_vm0, %v3144_v49  ;;  %v3147_v8 = vadd.f32 %v3115_v46, %v2955_v52  ;;  %v2954_v35 = vmul.f32 %v5893_v31, %v2902_v12  ;;  %v2917_v10 = vadd.f32 %v4230_v17, %v5825_v59 }
 0x566   :  { %v2911_v5 = vpop.f32.mrf.mxu1 }
 0x567   :  { %3179 = vst.msk [vmem:[%s6163_s18 + $0xe8] sm:$0xff] %vm105_vm0, %v3147_v8  ;;  %v3146_v24 = vadd.f32 %v3114_v2, %v2954_v35  ;;  %v2957_v54 = vmul.f32 %v5893_v31, %v2917_v10  ;;  %v2912_v27 = vadd.f32 %v5825_v59, %v2911_v5 }
 0x569   :  { %3178 = vst.msk [vmem:[%s6163_s18 + $0xe0] sm:$0xff] %vm105_vm0, %v3146_v24  ;;  %v3149_v28 = vadd.f32 %v3117_v25, %v2957_v54  ;;  %v2956_v32 = vmul.f32 %v5893_v31, %v2912_v27 }
 0x56b   :  { %3181 = vst.msk [vmem:[%s6163_s18 + $0xf8] sm:$0xff] %vm105_vm0, %v3149_v28  ;;  %v3148_v15 = vadd.f32 %v3116_v3, %v2956_v32 }
 0x56d   :  { %3180 = vst.msk [vmem:[%s6163_s18 + $0xf0] sm:$0xff] %vm105_vm0, %v3148_v15 }

</bundles_post_ra>
